<compile_context>
chip_gen: v7x
topology: tpu7x:2x2x1
jax: 0.10.0
libtpu: 0.0.40
codegen_flags: <defaults>
</compile_context>

<pallas_src>
import numpy as np
import jax
import jax.numpy as jnp
from jax import lax
from jax.experimental import pallas as pl
from jax.experimental.pallas import tpu as pltpu

EPS = 1e-5          # nn.BatchNorm default eps
NEG_SLOPE = 0.01    # nn.LeakyReLU default negative_slope


# ---------------------------------------------------------------------------
# In-kernel helpers
# ---------------------------------------------------------------------------

def _leaky_relu(x):
    return jnp.maximum(x, NEG_SLOPE * x)


def _make_encoder_kernel(conv_meta, fc_meta):
    """Build the fused encoder kernel (Nt images per grid step).

    conv_meta: tuple of (n_convs, pool, cout) per ConvDown block (static ints)
    fc_meta:   tuple of (is_flatten, apply_activation) per FC stage
    """

    def kernel(*refs):
        out_ref = refs[-1]
        it = iter(refs[:-1])

        # activation layout: (Nt*H, W*C)  == row-stacked NHWC of Nt images
        act = next(it)[...]

        # --- ConvDown: [conv(3x3,'same') + BN + LeakyReLU] * n_convs, MaxPool2d(pool)
        for n_convs, pool, cout in conv_meta:
            vmask_ref = next(it)                       # (K, Nt*H, 1) border masks
            K = vmask_ref.shape[0]
            nrows = act.shape[0]
            for _ in range(n_convs):
                m_ref = next(it)                       # (K, W*Cin, W*Cout) kron band
                b_ref = next(it)                       # (1, W*Cout)
                y = b_ref[...]
                for t in range(K):
                    dy = t - K // 2
                    if dy == 0:
                        rows = act
                    else:
                        # vertical tap: sublane roll (XLU) + border zero mask (VPU)
                        rows = (pltpu.roll(act, shift=(-dy) % nrows, axis=0)
                                * vmask_ref[t])
                    y = y + jnp.dot(rows, m_ref[t],
                                    preferred_element_type=jnp.float32)
                act = _leaky_relu(y)

            # max pool: roll+max on XLU/VPU, then host-constant 0/1 selection matmuls
            rsel_ref = next(it)                        # (Nt*Ho, Nt*H)
            csel_ref = next(it)                        # (W*C, Wo*C)
            nrows = act.shape[0]
            ncols = act.shape[1]
            rmax = act
            for q in range(1, pool):
                rmax = jnp.maximum(rmax, pltpu.roll(act, shift=(-q) % nrows, axis=0))
            cmax = rmax
            for q in range(1, pool):
                cmax = jnp.maximum(
                    cmax, pltpu.roll(rmax, shift=(-q * cout) % ncols, axis=1))
            act = jnp.dot(rsel_ref[...], cmax, preferred_element_type=jnp.float32)
            act = jnp.dot(act, csel_ref[...], preferred_element_type=jnp.float32)

        # --- Dense layers + merged MultiDense heads
        for is_flatten, apply_act in fc_meta:
            if is_flatten:
                wbig_ref = next(it)                    # (W*C, Hf*F) flatten+BN folded
                hmask_ref = next(it)                   # (Hf, Nt*Hf, 1) row%Hf masks
                gsum_ref = next(it)                    # (Nt, Nt*Hf) per-image row sum
                b_ref = next(it)                       # (1, F)
                Hf = hmask_ref.shape[0]
                ncols = wbig_ref.shape[1]
                F = ncols // Hf
                z = jnp.dot(act, wbig_ref[...], preferred_element_type=jnp.float32)
                d = hmask_ref[0] * z
                for h in range(1, Hf):
                    d = d + hmask_ref[h] * pltpu.roll(
                        z, shift=(-h * F) % ncols, axis=1)
                y = jnp.dot(gsum_ref[...], d[:, :F],
                            preferred_element_type=jnp.float32) + b_ref[...]
            else:
                w_ref = next(it)                       # (Fin, Fout)
                b_ref = next(it)                       # (1, Fout)
                y = jnp.dot(act, w_ref[...],
                            preferred_element_type=jnp.float32) + b_ref[...]
            act = _leaky_relu(y) if apply_act else y

        out_ref[0] = act.astype(out_ref.dtype)         # one (Nt, 2F) store per step

    return kernel


# ---------------------------------------------------------------------------
# Wrapper-side operand preparation (BN folding, layout folding) — plain XLA
# ---------------------------------------------------------------------------

def _bn_fold(b, gamma, beta, rmean, rvar):
    s = gamma / jnp.sqrt(rvar + EPS)
    return s, (b - rmean) * s + beta


def _conv_operands(lyr, W):
    """Per-vertical-tap matrices (K, W*Cin, W*Cout) with BN folded + bias row."""
    w = lyr["w"].astype(jnp.float32)                 # (Cout, Cin, K, K) torch layout
    cout, cin, K = w.shape[0], w.shape[1], w.shape[2]
    s, b_fold = _bn_fold(lyr["b"], lyr["gamma"], lyr["beta"],
                         lyr["rmean"], lyr["rvar"])
    w_eff = w * s[:, None, None, None]
    mats = []
    for ky in range(K):
        m = jnp.zeros((W * cin, W * cout), jnp.float32)
        for kx in range(K):
            dx = kx - K // 2
            tap = jnp.transpose(w_eff[:, :, ky, kx])             # (Cin, Cout)
            shift = jnp.asarray(np.eye(W, k=-dx), jnp.float32)   # w_in = w_out + dx
            m = m + jnp.kron(shift, tap)
        mats.append(m)
    bias_row = jnp.tile(b_fold, W).reshape(1, W * cout)
    return jnp.stack(mats, axis=0), bias_row


def _border_masks(Nt, H, K):
    """(K, Nt*H, 1): mask[t] zeroes rows whose source row r+dy leaves its image."""
    r = np.arange(Nt * H) % H
    masks = []
    for t in range(K):
        dy = t - K // 2
        masks.append(((r + dy >= 0) & (r + dy < H)).astype(np.float32))
    return jnp.asarray(np.stack(masks, 0)[:, :, None])


def _pool_row_select(Nt, H, pool):
    Ho = H // pool
    sel = np.zeros((Nt * Ho, Nt * H), np.float32)
    i = np.arange(Nt * Ho)
    sel[i, pool * i] = 1.0
    return jnp.asarray(sel)


def _pool_col_select(W, C, pool):
    Wo = W // pool
    sel = np.zeros((W * C, Wo * C), np.float32)
    j = np.arange(Wo * C)
    sel[pool * (j // C) * C + (j % C), j] = 1.0
    return jnp.asarray(sel)


def _row_mod_masks(Nt, Hf):
    r = np.arange(Nt * Hf) % Hf
    m = (np.arange(Hf)[:, None] == r[None, :]).astype(np.float32)
    return jnp.asarray(m[:, :, None])                             # (Hf, Nt*Hf, 1)


def _group_sum(Nt, Hf):
    g = np.zeros((Nt, Nt * Hf), np.float32)
    for n in range(Nt):
        g[n, n * Hf:(n + 1) * Hf] = 1.0
    return jnp.asarray(g)


def _conv_encoder_forward(x_nchw, params, pooling=2, images_per_step=2):
    N, C0, H0, W0 = x_nchw.shape
    Nt = max(1, min(int(images_per_step), N))
    pad = (-N) % Nt
    if pad:
        x_nchw = jnp.concatenate(
            [x_nchw, jnp.zeros((pad,) + x_nchw.shape[1:], x_nchw.dtype)], axis=0)
    Np = N + pad
    G = Np // Nt

    # stack batch into the row (sublane) axis: (Np*H0, W0*C0), row-major NHWC
    x_rows = (jnp.transpose(x_nchw, (0, 2, 3, 1))
              .reshape(Np * H0, W0 * C0).astype(jnp.float32))

    operands = [x_rows]
    in_specs = [pl.BlockSpec((Nt * H0, W0 * C0), lambda g: (g, 0))]

    def add_const(arr):
        arr = jnp.asarray(arr, jnp.float32)
        operands.append(arr)
        nd = arr.ndim
        # constants: same block every grid step -> fetched once, stays VMEM-resident
        in_specs.append(pl.BlockSpec(arr.shape, lambda g, _nd=nd: (0,) * _nd))

    # ---- ConvDown operands
    H, W, C = H0, W0, C0
    conv_meta = []
    for block in params["conv_blocks"]:
        K = int(block[0]["w"].shape[2])
        add_const(_border_masks(Nt, H, K))
        for lyr in block:
            m3, brow = _conv_operands(lyr, W)
            add_const(m3)
            add_const(brow)
            C = int(lyr["w"].shape[0])
        conv_meta.append((len(block), pooling, C))
        add_const(_pool_row_select(Nt, H, pooling))
        add_const(_pool_col_select(W, C, pooling))
        H //= pooling
        W //= pooling

    # ---- Dense layers + merged MultiDense heads
    fc_meta = []
    first_fc = True

    def add_fc(w, b, gamma=None, beta=None, rmean=None, rvar=None, act=True):
        nonlocal first_fc
        if gamma is not None:
            s, b_eff = _bn_fold(b, gamma, beta, rmean, rvar)
        else:
            s = jnp.ones((w.shape[0],), jnp.float32)
            b_eff = b.astype(jnp.float32)
        w_eff = w.astype(jnp.float32) * s[:, None]
        if first_fc:
            # fold torch.flatten(NCHW) order + the (H, W*C) row layout into one weight
            fout = int(w_eff.shape[0])
            w3 = jnp.transpose(w_eff.reshape(fout, C, H, W),
                               (2, 3, 1, 0)).reshape(H, W * C, fout)
            wbig = jnp.transpose(w3, (1, 0, 2)).reshape(W * C, H * fout)
            add_const(wbig)
            add_const(_row_mod_masks(Nt, H))
            add_const(_group_sum(Nt, H))
            fc_meta.append((True, act))
            first_fc = False
        else:
            add_const(jnp.transpose(w_eff))
            fc_meta.append((False, act))
        add_const(b_eff.reshape(1, -1))

    for lyr in params["dense_layers"]:
        add_fc(lyr["w"], lyr["b"], lyr["gamma"], lyr["beta"],
               lyr["rmean"], lyr["rvar"], act=True)

    dist = params["dist"]
    w_h = jnp.concatenate([dist["w_mu"], dist["w_ls"]], axis=0)   # (2F, Fin)
    b_h = jnp.concatenate([dist["b_mu"], dist["b_ls"]], axis=0)   # (2F,)
    add_fc(w_h, b_h, act=False)

    f2 = int(w_h.shape[0])
    kernel = _make_encoder_kernel(tuple(conv_meta), tuple(fc_meta))
    out = pl.pallas_call(
        kernel,
        out_shape=jax.ShapeDtypeStruct((G, Nt, f2), jnp.float32),
        grid=(G,),
        in_specs=in_specs,
        out_specs=pl.BlockSpec((1, Nt, f2), lambda g: (g, 0, 0)),
        compiler_params=pltpu.CompilerParams(dimension_semantics=("parallel",)),
    )(*operands)

    out = out.reshape(Np, f2)[:N]
    half = f2 // 2
    return out[:, :half], out[:, half:]                            # (mu, logsigma)


conv_encoder_forward = jax.jit(
    _conv_encoder_forward, static_argnames=("pooling", "images_per_step"))


# ---------------------------------------------------------------------------
# Pure-JAX reference (eval mode), for a numerical self-check
# ---------------------------------------------------------------------------

def _reference_forward(x_nchw, params, pooling=2):
    x = x_nchw.astype(jnp.float32)
    for block in params["conv_blocks"]:
        for lyr in block:
            x = lax.conv_general_dilated(
                x, lyr["w"].astype(jnp.float32), window_strides=(1, 1),
                padding="SAME", dimension_numbers=("NCHW", "OIHW", "NCHW"),
                precision=lax.Precision.HIGHEST)
            x = x + lyr["b"][None, :, None, None]
            s = lyr["gamma"] / jnp.sqrt(lyr["rvar"] + EPS)
            x = ((x - lyr["rmean"][None, :, None, None]) * s[None, :, None, None]
                 + lyr["beta"][None, :, None, None])
            x = jnp.where(x >= 0, x, NEG_SLOPE * x)
        x = lax.reduce_window(x, -jnp.inf, lax.max,
                              (1, 1, pooling, pooling), (1, 1, pooling, pooling),
                              "VALID")
    x = x.reshape(x.shape[0], -1)                                 # torch.flatten(NCHW)
    for lyr in params["dense_layers"]:
        x = jnp.dot(x, lyr["w"].T, precision=lax.Precision.HIGHEST) + lyr["b"]
        s = lyr["gamma"] / jnp.sqrt(lyr["rvar"] + EPS)
        x = (x - lyr["rmean"]) * s + lyr["beta"]
        x = jnp.where(x >= 0, x, NEG_SLOPE * x)
    dist = params["dist"]
    mu = jnp.dot(x, dist["w_mu"].T, precision=lax.Precision.HIGHEST) + dist["b_mu"]
    ls = jnp.dot(x, dist["w_ls"].T, precision=lax.Precision.HIGHEST) + dist["b_ls"]
    return mu, ls


# ---------------------------------------------------------------------------
# Deterministic synthetic parameter init (shapes follow the module's __init__)
# ---------------------------------------------------------------------------

def init_params(key, num_channels, num_features, K):
    ks = iter(jax.random.split(key, 64))

    def bn_params(c):
        return dict(
            gamma=1.0 + 0.1 * jax.random.normal(next(ks), (c,), jnp.float32),
            beta=0.1 * jax.random.normal(next(ks), (c,), jnp.float32),
            rmean=0.1 * jax.random.normal(next(ks), (c,), jnp.float32),
            rvar=1.0 + 0.1 * jnp.abs(jax.random.normal(next(ks), (c,), jnp.float32)),
        )

    conv_blocks = []
    for cin, cout in zip(num_channels[:-1], num_channels[1:]):
        block = []
        # double_conv=True, inout_first=True: first conv changes the channel count.
        for ci, co in ((cin, cout), (cout, cout)):
            lyr = dict(
                w=0.1 * jax.random.normal(next(ks), (co, ci, K, K), jnp.float32),
                b=0.1 * jax.random.normal(next(ks), (co,), jnp.float32),
            )
            lyr.update(bn_params(co))
            block.append(lyr)
        conv_blocks.append(block)

    dense_layers = []
    for fin, fout in zip(num_features[:-2], num_features[1:-1]):   # DenseBlock(num_features[:-1])
        lyr = dict(
            w=0.1 * jax.random.normal(next(ks), (fout, fin), jnp.float32),
            b=0.1 * jax.random.normal(next(ks), (fout,), jnp.float32),
        )
        lyr.update(bn_params(fout))
        dense_layers.append(lyr)

    fin, fout = num_features[-2], num_features[-1]                 # MultiDense, num_blocks=2
    dist = dict(
        w_mu=0.1 * jax.random.normal(next(ks), (fout, fin), jnp.float32),
        b_mu=0.1 * jax.random.normal(next(ks), (fout,), jnp.float32),
        w_ls=0.1 * jax.random.normal(next(ks), (fout, fin), jnp.float32),
        b_ls=0.1 * jax.random.normal(next(ks), (fout,), jnp.float32),
    )
    return dict(conv_blocks=conv_blocks, dense_layers=dense_layers, dist=dist)


# ---------------------------------------------------------------------------

if __name__ == "__main__":
    key = jax.random.PRNGKey(0)
    k_in, k_par = jax.random.split(key)

    K = 3
    num_channels = [4, 8, 16]                # 16x16 -> 8x8 -> 4x4 spatial
    num_features = [16 * 4 * 4, 64, 16]      # flat=256 -> 64 -> latent 16

    x = jax.random.normal(k_in, (4, 4, 16, 16), jnp.float32)   # NCHW, like PyTorch
    params = init_params(k_par, num_channels, num_features, K)

    mu, logsigma = conv_encoder_forward(x, params, images_per_step=2)
    jax.block_until_ready((mu, logsigma))

    assert mu.shape == (4, num_features[-1]), mu.shape
    assert logsigma.shape == (4, num_features[-1]), logsigma.shape
    assert bool(jnp.all(jnp.isfinite(mu))) and bool(jnp.all(jnp.isfinite(logsigma)))

    # numerical self-check against a plain-XLA f32 reference of the same module
    mu_ref, ls_ref = _reference_forward(x, params)
    err = max(float(jnp.max(jnp.abs(mu - mu_ref))),
              float(jnp.max(jnp.abs(logsigma - ls_ref))))
    assert err < 1e-3, f"max abs error vs JAX reference: {err}"

    print("KERNEL_OK")
</pallas_src>

<mosaic_0001>
module attributes {stable_mosaic.version = 11 : i64} {
  func.func @kernel(%arg0: i32, %arg1: memref<32x64xf32, #tpu.memory_space<vmem>>, %arg2: memref<3x32x1xf32, #tpu.memory_space<vmem>>, %arg3: memref<3x64x128xf32, #tpu.memory_space<vmem>>, %arg4: memref<1x128xf32, #tpu.memory_space<vmem>>, %arg5: memref<3x128x128xf32, #tpu.memory_space<vmem>>, %arg6: memref<1x128xf32, #tpu.memory_space<vmem>>, %arg7: memref<16x32xf32, #tpu.memory_space<vmem>>, %arg8: memref<128x64xf32, #tpu.memory_space<vmem>>, %arg9: memref<3x16x1xf32, #tpu.memory_space<vmem>>, %arg10: memref<3x64x128xf32, #tpu.memory_space<vmem>>, %arg11: memref<1x128xf32, #tpu.memory_space<vmem>>, %arg12: memref<3x128x128xf32, #tpu.memory_space<vmem>>, %arg13: memref<1x128xf32, #tpu.memory_space<vmem>>, %arg14: memref<8x16xf32, #tpu.memory_space<vmem>>, %arg15: memref<128x64xf32, #tpu.memory_space<vmem>>, %arg16: memref<64x256xf32, #tpu.memory_space<vmem>>, %arg17: memref<4x8x1xf32, #tpu.memory_space<vmem>>, %arg18: memref<2x8xf32, #tpu.memory_space<vmem>>, %arg19: memref<1x64xf32, #tpu.memory_space<vmem>>, %arg20: memref<64x32xf32, #tpu.memory_space<vmem>>, %arg21: memref<1x32xf32, #tpu.memory_space<vmem>>, %arg22: memref<1x2x32xf32, #tpu.memory_space<vmem>>) attributes {dimension_semantics = [#tpu.dimension_semantics<parallel>], iteration_bounds = array<i64: 2>, scalar_prefetch = 0 : i64, scratch_operands = 0 : i64, tpu.core_type = #tpu.core_type<tc>, window_params = [{transform_indices = @transform_0, window_bounds = array<i64: 32, 64>}, {pipeline_mode = #tpu.pipeline_mode<synchronous>, transform_indices = @transform_1, window_bounds = array<i64: 3, 32, 1>}, {pipeline_mode = #tpu.pipeline_mode<synchronous>, transform_indices = @transform_2, window_bounds = array<i64: 3, 64, 128>}, {pipeline_mode = #tpu.pipeline_mode<synchronous>, transform_indices = @transform_3, window_bounds = array<i64: 1, 128>}, {pipeline_mode = #tpu.pipeline_mode<synchronous>, transform_indices = @transform_4, window_bounds = array<i64: 3, 128, 128>}, {pipeline_mode = #tpu.pipeline_mode<synchronous>, transform_indices = @transform_5, window_bounds = array<i64: 1, 128>}, {pipeline_mode = #tpu.pipeline_mode<synchronous>, transform_indices = @transform_6, window_bounds = array<i64: 16, 32>}, {pipeline_mode = #tpu.pipeline_mode<synchronous>, transform_indices = @transform_7, window_bounds = array<i64: 128, 64>}, {pipeline_mode = #tpu.pipeline_mode<synchronous>, transform_indices = @transform_8, window_bounds = array<i64: 3, 16, 1>}, {pipeline_mode = #tpu.pipeline_mode<synchronous>, transform_indices = @transform_9, window_bounds = array<i64: 3, 64, 128>}, {pipeline_mode = #tpu.pipeline_mode<synchronous>, transform_indices = @transform_10, window_bounds = array<i64: 1, 128>}, {pipeline_mode = #tpu.pipeline_mode<synchronous>, transform_indices = @transform_11, window_bounds = array<i64: 3, 128, 128>}, {pipeline_mode = #tpu.pipeline_mode<synchronous>, transform_indices = @transform_12, window_bounds = array<i64: 1, 128>}, {pipeline_mode = #tpu.pipeline_mode<synchronous>, transform_indices = @transform_13, window_bounds = array<i64: 8, 16>}, {pipeline_mode = #tpu.pipeline_mode<synchronous>, transform_indices = @transform_14, window_bounds = array<i64: 128, 64>}, {pipeline_mode = #tpu.pipeline_mode<synchronous>, transform_indices = @transform_15, window_bounds = array<i64: 64, 256>}, {pipeline_mode = #tpu.pipeline_mode<synchronous>, transform_indices = @transform_16, window_bounds = array<i64: 4, 8, 1>}, {pipeline_mode = #tpu.pipeline_mode<synchronous>, transform_indices = @transform_17, window_bounds = array<i64: 2, 8>}, {pipeline_mode = #tpu.pipeline_mode<synchronous>, transform_indices = @transform_18, window_bounds = array<i64: 1, 64>}, {pipeline_mode = #tpu.pipeline_mode<synchronous>, transform_indices = @transform_19, window_bounds = array<i64: 64, 32>}, {pipeline_mode = #tpu.pipeline_mode<synchronous>, transform_indices = @transform_20, window_bounds = array<i64: 1, 32>}, {transform_indices = @transform_21, window_bounds = array<i64: 1, 2, 32>}]} {
    %c0 = arith.constant 0 : index
    %c0_0 = arith.constant 0 : index
    %0 = vector.load %arg1[%c0, %c0_0] : memref<32x64xf32, #tpu.memory_space<vmem>>, vector<32x64xf32>
    %c0_1 = arith.constant 0 : index
    %c0_2 = arith.constant 0 : index
    %1 = vector.load %arg4[%c0_1, %c0_2] : memref<1x128xf32, #tpu.memory_space<vmem>>, vector<1x128xf32>
    %c1_i32 = arith.constant 1 : i32
    %2 = tpu.dynamic_rotate %0 by %c1_i32 dim 0 : vector<32x64xf32>, i32 -> vector<32x64xf32>
    %c0_3 = arith.constant 0 : index
    %c0_4 = arith.constant 0 : index
    %c0_5 = arith.constant 0 : index
    %3 = vector.load %arg2[%c0_3, %c0_4, %c0_5] : memref<3x32x1xf32, #tpu.memory_space<vmem>>, vector<1x32x1xf32>
    %4 = vector.shape_cast %3 : vector<1x32x1xf32> to vector<32x1xf32>
    %5 = vector.broadcast %4 : vector<32x1xf32> to vector<32x64xf32>
    %6 = arith.mulf %2, %5 : vector<32x64xf32>
    %c0_6 = arith.constant 0 : index
    %c0_7 = arith.constant 0 : index
    %c0_8 = arith.constant 0 : index
    %7 = vector.load %arg3[%c0_6, %c0_7, %c0_8] : memref<3x64x128xf32, #tpu.memory_space<vmem>>, vector<1x64x128xf32>
    %8 = vector.shape_cast %7 : vector<1x64x128xf32> to vector<64x128xf32>
    %cst = arith.constant dense<0.000000e+00> : vector<32x128xf32>
    %9 = tpu.matmul %6, %8, %cst {dimension_numbers = #tpu.dot_dimension_numbers<[1], [0], [0], [1], [0, 0, 1, 1], [], []>} : vector<32x64xf32>, vector<64x128xf32>, vector<32x128xf32> -> vector<32x128xf32>
    %10 = vector.broadcast %1 : vector<1x128xf32> to vector<32x128xf32>
    %11 = arith.addf %10, %9 : vector<32x128xf32>
    %c1 = arith.constant 1 : index
    %c0_9 = arith.constant 0 : index
    %c0_10 = arith.constant 0 : index
    %12 = vector.load %arg3[%c1, %c0_9, %c0_10] : memref<3x64x128xf32, #tpu.memory_space<vmem>>, vector<1x64x128xf32>
    %13 = vector.shape_cast %12 : vector<1x64x128xf32> to vector<64x128xf32>
    %cst_11 = arith.constant dense<0.000000e+00> : vector<32x128xf32>
    %14 = tpu.matmul %0, %13, %cst_11 {dimension_numbers = #tpu.dot_dimension_numbers<[1], [0], [0], [1], [0, 0, 1, 1], [], []>} : vector<32x64xf32>, vector<64x128xf32>, vector<32x128xf32> -> vector<32x128xf32>
    %15 = arith.addf %11, %14 : vector<32x128xf32>
    %c31_i32 = arith.constant 31 : i32
    %16 = tpu.dynamic_rotate %0 by %c31_i32 dim 0 : vector<32x64xf32>, i32 -> vector<32x64xf32>
    %c2 = arith.constant 2 : index
    %c0_12 = arith.constant 0 : index
    %c0_13 = arith.constant 0 : index
    %17 = vector.load %arg2[%c2, %c0_12, %c0_13] : memref<3x32x1xf32, #tpu.memory_space<vmem>>, vector<1x32x1xf32>
    %18 = vector.shape_cast %17 : vector<1x32x1xf32> to vector<32x1xf32>
    %19 = vector.broadcast %18 : vector<32x1xf32> to vector<32x64xf32>
    %20 = arith.mulf %16, %19 : vector<32x64xf32>
    %c2_14 = arith.constant 2 : index
    %c0_15 = arith.constant 0 : index
    %c0_16 = arith.constant 0 : index
    %21 = vector.load %arg3[%c2_14, %c0_15, %c0_16] : memref<3x64x128xf32, #tpu.memory_space<vmem>>, vector<1x64x128xf32>
    %22 = vector.shape_cast %21 : vector<1x64x128xf32> to vector<64x128xf32>
    %cst_17 = arith.constant dense<0.000000e+00> : vector<32x128xf32>
    %23 = tpu.matmul %20, %22, %cst_17 {dimension_numbers = #tpu.dot_dimension_numbers<[1], [0], [0], [1], [0, 0, 1, 1], [], []>} : vector<32x64xf32>, vector<64x128xf32>, vector<32x128xf32> -> vector<32x128xf32>
    %24 = arith.addf %15, %23 : vector<32x128xf32>
    %cst_18 = arith.constant 0.00999999977 : f32
    %25 = vector.broadcast %cst_18 : f32 to vector<32x128xf32>
    %26 = arith.mulf %25, %24 : vector<32x128xf32>
    %27 = arith.maximumf %24, %26 : vector<32x128xf32>
    %c0_19 = arith.constant 0 : index
    %c0_20 = arith.constant 0 : index
    %28 = vector.load %arg6[%c0_19, %c0_20] : memref<1x128xf32, #tpu.memory_space<vmem>>, vector<1x128xf32>
    %c1_i32_21 = arith.constant 1 : i32
    %29 = tpu.dynamic_rotate %27 by %c1_i32_21 dim 0 : vector<32x128xf32>, i32 -> vector<32x128xf32>
    %c0_22 = arith.constant 0 : index
    %c0_23 = arith.constant 0 : index
    %c0_24 = arith.constant 0 : index
    %30 = vector.load %arg2[%c0_22, %c0_23, %c0_24] : memref<3x32x1xf32, #tpu.memory_space<vmem>>, vector<1x32x1xf32>
    %31 = vector.shape_cast %30 : vector<1x32x1xf32> to vector<32x1xf32>
    %32 = vector.broadcast %31 : vector<32x1xf32> to vector<32x128xf32>
    %33 = arith.mulf %29, %32 : vector<32x128xf32>
    %c0_25 = arith.constant 0 : index
    %c0_26 = arith.constant 0 : index
    %c0_27 = arith.constant 0 : index
    %34 = vector.load %arg5[%c0_25, %c0_26, %c0_27] : memref<3x128x128xf32, #tpu.memory_space<vmem>>, vector<1x128x128xf32>
    %35 = vector.shape_cast %34 : vector<1x128x128xf32> to vector<128x128xf32>
    %cst_28 = arith.constant dense<0.000000e+00> : vector<32x128xf32>
    %36 = tpu.matmul %33, %35, %cst_28 {dimension_numbers = #tpu.dot_dimension_numbers<[1], [0], [0], [1], [0, 0, 1, 1], [], []>} : vector<32x128xf32>, vector<128x128xf32>, vector<32x128xf32> -> vector<32x128xf32>
    %37 = vector.broadcast %28 : vector<1x128xf32> to vector<32x128xf32>
    %38 = arith.addf %37, %36 : vector<32x128xf32>
    %c1_29 = arith.constant 1 : index
    %c0_30 = arith.constant 0 : index
    %c0_31 = arith.constant 0 : index
    %39 = vector.load %arg5[%c1_29, %c0_30, %c0_31] : memref<3x128x128xf32, #tpu.memory_space<vmem>>, vector<1x128x128xf32>
    %40 = vector.shape_cast %39 : vector<1x128x128xf32> to vector<128x128xf32>
    %cst_32 = arith.constant dense<0.000000e+00> : vector<32x128xf32>
    %41 = tpu.matmul %27, %40, %cst_32 {dimension_numbers = #tpu.dot_dimension_numbers<[1], [0], [0], [1], [0, 0, 1, 1], [], []>} : vector<32x128xf32>, vector<128x128xf32>, vector<32x128xf32> -> vector<32x128xf32>
    %42 = arith.addf %38, %41 : vector<32x128xf32>
    %c31_i32_33 = arith.constant 31 : i32
    %43 = tpu.dynamic_rotate %27 by %c31_i32_33 dim 0 : vector<32x128xf32>, i32 -> vector<32x128xf32>
    %c2_34 = arith.constant 2 : index
    %c0_35 = arith.constant 0 : index
    %c0_36 = arith.constant 0 : index
    %44 = vector.load %arg2[%c2_34, %c0_35, %c0_36] : memref<3x32x1xf32, #tpu.memory_space<vmem>>, vector<1x32x1xf32>
    %45 = vector.shape_cast %44 : vector<1x32x1xf32> to vector<32x1xf32>
    %46 = vector.broadcast %45 : vector<32x1xf32> to vector<32x128xf32>
    %47 = arith.mulf %43, %46 : vector<32x128xf32>
    %c2_37 = arith.constant 2 : index
    %c0_38 = arith.constant 0 : index
    %c0_39 = arith.constant 0 : index
    %48 = vector.load %arg5[%c2_37, %c0_38, %c0_39] : memref<3x128x128xf32, #tpu.memory_space<vmem>>, vector<1x128x128xf32>
    %49 = vector.shape_cast %48 : vector<1x128x128xf32> to vector<128x128xf32>
    %cst_40 = arith.constant dense<0.000000e+00> : vector<32x128xf32>
    %50 = tpu.matmul %47, %49, %cst_40 {dimension_numbers = #tpu.dot_dimension_numbers<[1], [0], [0], [1], [0, 0, 1, 1], [], []>} : vector<32x128xf32>, vector<128x128xf32>, vector<32x128xf32> -> vector<32x128xf32>
    %51 = arith.addf %42, %50 : vector<32x128xf32>
    %cst_41 = arith.constant 0.00999999977 : f32
    %52 = vector.broadcast %cst_41 : f32 to vector<32x128xf32>
    %53 = arith.mulf %52, %51 : vector<32x128xf32>
    %54 = arith.maximumf %51, %53 : vector<32x128xf32>
    %c31_i32_42 = arith.constant 31 : i32
    %55 = tpu.dynamic_rotate %54 by %c31_i32_42 dim 0 : vector<32x128xf32>, i32 -> vector<32x128xf32>
    %56 = arith.maximumf %54, %55 : vector<32x128xf32>
    %c120_i32 = arith.constant 120 : i32
    %57 = tpu.dynamic_rotate %56 by %c120_i32 dim 1 : vector<32x128xf32>, i32 -> vector<32x128xf32>
    %58 = arith.maximumf %56, %57 : vector<32x128xf32>
    %c0_43 = arith.constant 0 : index
    %c0_44 = arith.constant 0 : index
    %59 = vector.load %arg7[%c0_43, %c0_44] : memref<16x32xf32, #tpu.memory_space<vmem>>, vector<16x32xf32>
    %cst_45 = arith.constant dense<0.000000e+00> : vector<16x128xf32>
    %60 = tpu.matmul %59, %58, %cst_45 {dimension_numbers = #tpu.dot_dimension_numbers<[1], [0], [0], [1], [0, 0, 1, 1], [], []>} : vector<16x32xf32>, vector<32x128xf32>, vector<16x128xf32> -> vector<16x128xf32>
    %c0_46 = arith.constant 0 : index
    %c0_47 = arith.constant 0 : index
    %61 = vector.load %arg8[%c0_46, %c0_47] : memref<128x64xf32, #tpu.memory_space<vmem>>, vector<128x64xf32>
    %cst_48 = arith.constant dense<0.000000e+00> : vector<16x64xf32>
    %62 = tpu.matmul %60, %61, %cst_48 {dimension_numbers = #tpu.dot_dimension_numbers<[1], [0], [0], [1], [0, 0, 1, 1], [], []>} : vector<16x128xf32>, vector<128x64xf32>, vector<16x64xf32> -> vector<16x64xf32>
    %c0_49 = arith.constant 0 : index
    %c0_50 = arith.constant 0 : index
    %63 = vector.load %arg11[%c0_49, %c0_50] : memref<1x128xf32, #tpu.memory_space<vmem>>, vector<1x128xf32>
    %c1_i32_51 = arith.constant 1 : i32
    %64 = tpu.dynamic_rotate %62 by %c1_i32_51 dim 0 : vector<16x64xf32>, i32 -> vector<16x64xf32>
    %c0_52 = arith.constant 0 : index
    %c0_53 = arith.constant 0 : index
    %c0_54 = arith.constant 0 : index
    %65 = vector.load %arg9[%c0_52, %c0_53, %c0_54] : memref<3x16x1xf32, #tpu.memory_space<vmem>>, vector<1x16x1xf32>
    %66 = vector.shape_cast %65 : vector<1x16x1xf32> to vector<16x1xf32>
    %67 = vector.broadcast %66 : vector<16x1xf32> to vector<16x64xf32>
    %68 = arith.mulf %64, %67 : vector<16x64xf32>
    %c0_55 = arith.constant 0 : index
    %c0_56 = arith.constant 0 : index
    %c0_57 = arith.constant 0 : index
    %69 = vector.load %arg10[%c0_55, %c0_56, %c0_57] : memref<3x64x128xf32, #tpu.memory_space<vmem>>, vector<1x64x128xf32>
    %70 = vector.shape_cast %69 : vector<1x64x128xf32> to vector<64x128xf32>
    %cst_58 = arith.constant dense<0.000000e+00> : vector<16x128xf32>
    %71 = tpu.matmul %68, %70, %cst_58 {dimension_numbers = #tpu.dot_dimension_numbers<[1], [0], [0], [1], [0, 0, 1, 1], [], []>} : vector<16x64xf32>, vector<64x128xf32>, vector<16x128xf32> -> vector<16x128xf32>
    %72 = vector.broadcast %63 : vector<1x128xf32> to vector<16x128xf32>
    %73 = arith.addf %72, %71 : vector<16x128xf32>
    %c1_59 = arith.constant 1 : index
    %c0_60 = arith.constant 0 : index
    %c0_61 = arith.constant 0 : index
    %74 = vector.load %arg10[%c1_59, %c0_60, %c0_61] : memref<3x64x128xf32, #tpu.memory_space<vmem>>, vector<1x64x128xf32>
    %75 = vector.shape_cast %74 : vector<1x64x128xf32> to vector<64x128xf32>
    %cst_62 = arith.constant dense<0.000000e+00> : vector<16x128xf32>
    %76 = tpu.matmul %62, %75, %cst_62 {dimension_numbers = #tpu.dot_dimension_numbers<[1], [0], [0], [1], [0, 0, 1, 1], [], []>} : vector<16x64xf32>, vector<64x128xf32>, vector<16x128xf32> -> vector<16x128xf32>
    %77 = arith.addf %73, %76 : vector<16x128xf32>
    %c15_i32 = arith.constant 15 : i32
    %78 = tpu.dynamic_rotate %62 by %c15_i32 dim 0 : vector<16x64xf32>, i32 -> vector<16x64xf32>
    %c2_63 = arith.constant 2 : index
    %c0_64 = arith.constant 0 : index
    %c0_65 = arith.constant 0 : index
    %79 = vector.load %arg9[%c2_63, %c0_64, %c0_65] : memref<3x16x1xf32, #tpu.memory_space<vmem>>, vector<1x16x1xf32>
    %80 = vector.shape_cast %79 : vector<1x16x1xf32> to vector<16x1xf32>
    %81 = vector.broadcast %80 : vector<16x1xf32> to vector<16x64xf32>
    %82 = arith.mulf %78, %81 : vector<16x64xf32>
    %c2_66 = arith.constant 2 : index
    %c0_67 = arith.constant 0 : index
    %c0_68 = arith.constant 0 : index
    %83 = vector.load %arg10[%c2_66, %c0_67, %c0_68] : memref<3x64x128xf32, #tpu.memory_space<vmem>>, vector<1x64x128xf32>
    %84 = vector.shape_cast %83 : vector<1x64x128xf32> to vector<64x128xf32>
    %cst_69 = arith.constant dense<0.000000e+00> : vector<16x128xf32>
    %85 = tpu.matmul %82, %84, %cst_69 {dimension_numbers = #tpu.dot_dimension_numbers<[1], [0], [0], [1], [0, 0, 1, 1], [], []>} : vector<16x64xf32>, vector<64x128xf32>, vector<16x128xf32> -> vector<16x128xf32>
    %86 = arith.addf %77, %85 : vector<16x128xf32>
    %cst_70 = arith.constant 0.00999999977 : f32
    %87 = vector.broadcast %cst_70 : f32 to vector<16x128xf32>
    %88 = arith.mulf %87, %86 : vector<16x128xf32>
    %89 = arith.maximumf %86, %88 : vector<16x128xf32>
    %c0_71 = arith.constant 0 : index
    %c0_72 = arith.constant 0 : index
    %90 = vector.load %arg13[%c0_71, %c0_72] : memref<1x128xf32, #tpu.memory_space<vmem>>, vector<1x128xf32>
    %c1_i32_73 = arith.constant 1 : i32
    %91 = tpu.dynamic_rotate %89 by %c1_i32_73 dim 0 : vector<16x128xf32>, i32 -> vector<16x128xf32>
    %c0_74 = arith.constant 0 : index
    %c0_75 = arith.constant 0 : index
    %c0_76 = arith.constant 0 : index
    %92 = vector.load %arg9[%c0_74, %c0_75, %c0_76] : memref<3x16x1xf32, #tpu.memory_space<vmem>>, vector<1x16x1xf32>
    %93 = vector.shape_cast %92 : vector<1x16x1xf32> to vector<16x1xf32>
    %94 = vector.broadcast %93 : vector<16x1xf32> to vector<16x128xf32>
    %95 = arith.mulf %91, %94 : vector<16x128xf32>
    %c0_77 = arith.constant 0 : index
    %c0_78 = arith.constant 0 : index
    %c0_79 = arith.constant 0 : index
    %96 = vector.load %arg12[%c0_77, %c0_78, %c0_79] : memref<3x128x128xf32, #tpu.memory_space<vmem>>, vector<1x128x128xf32>
    %97 = vector.shape_cast %96 : vector<1x128x128xf32> to vector<128x128xf32>
    %cst_80 = arith.constant dense<0.000000e+00> : vector<16x128xf32>
    %98 = tpu.matmul %95, %97, %cst_80 {dimension_numbers = #tpu.dot_dimension_numbers<[1], [0], [0], [1], [0, 0, 1, 1], [], []>} : vector<16x128xf32>, vector<128x128xf32>, vector<16x128xf32> -> vector<16x128xf32>
    %99 = vector.broadcast %90 : vector<1x128xf32> to vector<16x128xf32>
    %100 = arith.addf %99, %98 : vector<16x128xf32>
    %c1_81 = arith.constant 1 : index
    %c0_82 = arith.constant 0 : index
    %c0_83 = arith.constant 0 : index
    %101 = vector.load %arg12[%c1_81, %c0_82, %c0_83] : memref<3x128x128xf32, #tpu.memory_space<vmem>>, vector<1x128x128xf32>
    %102 = vector.shape_cast %101 : vector<1x128x128xf32> to vector<128x128xf32>
    %cst_84 = arith.constant dense<0.000000e+00> : vector<16x128xf32>
    %103 = tpu.matmul %89, %102, %cst_84 {dimension_numbers = #tpu.dot_dimension_numbers<[1], [0], [0], [1], [0, 0, 1, 1], [], []>} : vector<16x128xf32>, vector<128x128xf32>, vector<16x128xf32> -> vector<16x128xf32>
    %104 = arith.addf %100, %103 : vector<16x128xf32>
    %c15_i32_85 = arith.constant 15 : i32
    %105 = tpu.dynamic_rotate %89 by %c15_i32_85 dim 0 : vector<16x128xf32>, i32 -> vector<16x128xf32>
    %c2_86 = arith.constant 2 : index
    %c0_87 = arith.constant 0 : index
    %c0_88 = arith.constant 0 : index
    %106 = vector.load %arg9[%c2_86, %c0_87, %c0_88] : memref<3x16x1xf32, #tpu.memory_space<vmem>>, vector<1x16x1xf32>
    %107 = vector.shape_cast %106 : vector<1x16x1xf32> to vector<16x1xf32>
    %108 = vector.broadcast %107 : vector<16x1xf32> to vector<16x128xf32>
    %109 = arith.mulf %105, %108 : vector<16x128xf32>
    %c2_89 = arith.constant 2 : index
    %c0_90 = arith.constant 0 : index
    %c0_91 = arith.constant 0 : index
    %110 = vector.load %arg12[%c2_89, %c0_90, %c0_91] : memref<3x128x128xf32, #tpu.memory_space<vmem>>, vector<1x128x128xf32>
    %111 = vector.shape_cast %110 : vector<1x128x128xf32> to vector<128x128xf32>
    %cst_92 = arith.constant dense<0.000000e+00> : vector<16x128xf32>
    %112 = tpu.matmul %109, %111, %cst_92 {dimension_numbers = #tpu.dot_dimension_numbers<[1], [0], [0], [1], [0, 0, 1, 1], [], []>} : vector<16x128xf32>, vector<128x128xf32>, vector<16x128xf32> -> vector<16x128xf32>
    %113 = arith.addf %104, %112 : vector<16x128xf32>
    %cst_93 = arith.constant 0.00999999977 : f32
    %114 = vector.broadcast %cst_93 : f32 to vector<16x128xf32>
    %115 = arith.mulf %114, %113 : vector<16x128xf32>
    %116 = arith.maximumf %113, %115 : vector<16x128xf32>
    %c15_i32_94 = arith.constant 15 : i32
    %117 = tpu.dynamic_rotate %116 by %c15_i32_94 dim 0 : vector<16x128xf32>, i32 -> vector<16x128xf32>
    %118 = arith.maximumf %116, %117 : vector<16x128xf32>
    %c112_i32 = arith.constant 112 : i32
    %119 = tpu.dynamic_rotate %118 by %c112_i32 dim 1 : vector<16x128xf32>, i32 -> vector<16x128xf32>
    %120 = arith.maximumf %118, %119 : vector<16x128xf32>
    %c0_95 = arith.constant 0 : index
    %c0_96 = arith.constant 0 : index
    %121 = vector.load %arg14[%c0_95, %c0_96] : memref<8x16xf32, #tpu.memory_space<vmem>>, vector<8x16xf32>
    %cst_97 = arith.constant dense<0.000000e+00> : vector<8x128xf32>
    %122 = tpu.matmul %121, %120, %cst_97 {dimension_numbers = #tpu.dot_dimension_numbers<[1], [0], [0], [1], [0, 0, 1, 1], [], []>} : vector<8x16xf32>, vector<16x128xf32>, vector<8x128xf32> -> vector<8x128xf32>
    %c0_98 = arith.constant 0 : index
    %c0_99 = arith.constant 0 : index
    %123 = vector.load %arg15[%c0_98, %c0_99] : memref<128x64xf32, #tpu.memory_space<vmem>>, vector<128x64xf32>
    %cst_100 = arith.constant dense<0.000000e+00> : vector<8x64xf32>
    %124 = tpu.matmul %122, %123, %cst_100 {dimension_numbers = #tpu.dot_dimension_numbers<[1], [0], [0], [1], [0, 0, 1, 1], [], []>} : vector<8x128xf32>, vector<128x64xf32>, vector<8x64xf32> -> vector<8x64xf32>
    %c0_101 = arith.constant 0 : index
    %c0_102 = arith.constant 0 : index
    %125 = vector.load %arg16[%c0_101, %c0_102] : memref<64x256xf32, #tpu.memory_space<vmem>>, vector<64x256xf32>
    %cst_103 = arith.constant dense<0.000000e+00> : vector<8x256xf32>
    %126 = tpu.matmul %124, %125, %cst_103 {dimension_numbers = #tpu.dot_dimension_numbers<[1], [0], [0], [1], [0, 0, 1, 1], [], []>} : vector<8x64xf32>, vector<64x256xf32>, vector<8x256xf32> -> vector<8x256xf32>
    %c0_104 = arith.constant 0 : index
    %c0_105 = arith.constant 0 : index
    %c0_106 = arith.constant 0 : index
    %127 = vector.load %arg17[%c0_104, %c0_105, %c0_106] : memref<4x8x1xf32, #tpu.memory_space<vmem>>, vector<1x8x1xf32>
    %128 = vector.shape_cast %127 : vector<1x8x1xf32> to vector<8x1xf32>
    %129 = vector.broadcast %128 : vector<8x1xf32> to vector<8x256xf32>
    %130 = arith.mulf %129, %126 : vector<8x256xf32>
    %c1_107 = arith.constant 1 : index
    %c0_108 = arith.constant 0 : index
    %c0_109 = arith.constant 0 : index
    %131 = vector.load %arg17[%c1_107, %c0_108, %c0_109] : memref<4x8x1xf32, #tpu.memory_space<vmem>>, vector<1x8x1xf32>
    %132 = vector.shape_cast %131 : vector<1x8x1xf32> to vector<8x1xf32>
    %c192_i32 = arith.constant 192 : i32
    %133 = tpu.dynamic_rotate %126 by %c192_i32 dim 1 : vector<8x256xf32>, i32 -> vector<8x256xf32>
    %134 = vector.broadcast %132 : vector<8x1xf32> to vector<8x256xf32>
    %135 = arith.mulf %134, %133 : vector<8x256xf32>
    %136 = arith.addf %130, %135 : vector<8x256xf32>
    %c2_110 = arith.constant 2 : index
    %c0_111 = arith.constant 0 : index
    %c0_112 = arith.constant 0 : index
    %137 = vector.load %arg17[%c2_110, %c0_111, %c0_112] : memref<4x8x1xf32, #tpu.memory_space<vmem>>, vector<1x8x1xf32>
    %138 = vector.shape_cast %137 : vector<1x8x1xf32> to vector<8x1xf32>
    %c128_i32 = arith.constant 128 : i32
    %139 = tpu.dynamic_rotate %126 by %c128_i32 dim 1 : vector<8x256xf32>, i32 -> vector<8x256xf32>
    %140 = vector.broadcast %138 : vector<8x1xf32> to vector<8x256xf32>
    %141 = arith.mulf %140, %139 : vector<8x256xf32>
    %142 = arith.addf %136, %141 : vector<8x256xf32>
    %c3 = arith.constant 3 : index
    %c0_113 = arith.constant 0 : index
    %c0_114 = arith.constant 0 : index
    %143 = vector.load %arg17[%c3, %c0_113, %c0_114] : memref<4x8x1xf32, #tpu.memory_space<vmem>>, vector<1x8x1xf32>
    %144 = vector.shape_cast %143 : vector<1x8x1xf32> to vector<8x1xf32>
    %c64_i32 = arith.constant 64 : i32
    %145 = tpu.dynamic_rotate %126 by %c64_i32 dim 1 : vector<8x256xf32>, i32 -> vector<8x256xf32>
    %146 = vector.broadcast %144 : vector<8x1xf32> to vector<8x256xf32>
    %147 = arith.mulf %146, %145 : vector<8x256xf32>
    %148 = arith.addf %142, %147 : vector<8x256xf32>
    %c0_115 = arith.constant 0 : index
    %c0_116 = arith.constant 0 : index
    %149 = vector.load %arg18[%c0_115, %c0_116] : memref<2x8xf32, #tpu.memory_space<vmem>>, vector<2x8xf32>
    %150 = vector.extract_strided_slice %148 {offsets = [0, 0], sizes = [8, 64], strides = [1, 1]} : vector<8x256xf32> to vector<8x64xf32>
    %cst_117 = arith.constant dense<0.000000e+00> : vector<2x64xf32>
    %151 = tpu.matmul %149, %150, %cst_117 {dimension_numbers = #tpu.dot_dimension_numbers<[1], [0], [0], [1], [0, 0, 1, 1], [], []>} : vector<2x8xf32>, vector<8x64xf32>, vector<2x64xf32> -> vector<2x64xf32>
    %c0_118 = arith.constant 0 : index
    %c0_119 = arith.constant 0 : index
    %152 = vector.load %arg19[%c0_118, %c0_119] : memref<1x64xf32, #tpu.memory_space<vmem>>, vector<1x64xf32>
    %153 = vector.broadcast %152 : vector<1x64xf32> to vector<2x64xf32>
    %154 = arith.addf %151, %153 : vector<2x64xf32>
    %cst_120 = arith.constant 0.00999999977 : f32
    %155 = vector.broadcast %cst_120 : f32 to vector<2x64xf32>
    %156 = arith.mulf %155, %154 : vector<2x64xf32>
    %157 = arith.maximumf %154, %156 : vector<2x64xf32>
    %c0_121 = arith.constant 0 : index
    %c0_122 = arith.constant 0 : index
    %158 = vector.load %arg20[%c0_121, %c0_122] : memref<64x32xf32, #tpu.memory_space<vmem>>, vector<64x32xf32>
    %cst_123 = arith.constant dense<0.000000e+00> : vector<2x32xf32>
    %159 = tpu.matmul %157, %158, %cst_123 {dimension_numbers = #tpu.dot_dimension_numbers<[1], [0], [0], [1], [0, 0, 1, 1], [], []>} : vector<2x64xf32>, vector<64x32xf32>, vector<2x32xf32> -> vector<2x32xf32>
    %c0_124 = arith.constant 0 : index
    %c0_125 = arith.constant 0 : index
    %160 = vector.load %arg21[%c0_124, %c0_125] : memref<1x32xf32, #tpu.memory_space<vmem>>, vector<1x32xf32>
    %161 = vector.broadcast %160 : vector<1x32xf32> to vector<2x32xf32>
    %162 = arith.addf %159, %161 : vector<2x32xf32>
    %c0_126 = arith.constant 0 : index
    %c0_127 = arith.constant 0 : index
    %c0_128 = arith.constant 0 : index
    %163 = vector.load %arg22[%c0_126, %c0_127, %c0_128] : memref<1x2x32xf32, #tpu.memory_space<vmem>>, vector<1x2x32xf32>
    %164 = vector.shape_cast %163 : vector<1x2x32xf32> to vector<2x32xf32>
    %165 = vector.shape_cast %162 : vector<2x32xf32> to vector<1x2x32xf32>
    tpu.vector_store %arg22[%c0_126, %c0_127, %c0_128], %165 {strides = array<i32>} : memref<1x2x32xf32, #tpu.memory_space<vmem>>, vector<1x2x32xf32>,
    return
  }
  func.func @transform_0(%arg0: i32) -> (i32, i32) {
    %c0_i32 = arith.constant 0 : i32
    %c0_i32_0 = arith.constant 0 : i32
    return %arg0, %c0_i32 : i32, i32
  }
  func.func @transform_1(%arg0: i32) -> (i32, i32, i32) {
    %c0_i32 = arith.constant 0 : i32
    %c0_i32_0 = arith.constant 0 : i32
    %c0_i32_1 = arith.constant 0 : i32
    %c0_i32_2 = arith.constant 0 : i32
    return %c0_i32, %c0_i32_0, %c0_i32_1 : i32, i32, i32
  }
  func.func @transform_2(%arg0: i32) -> (i32, i32, i32) {
    %c0_i32 = arith.constant 0 : i32
    %c0_i32_0 = arith.constant 0 : i32
    %c0_i32_1 = arith.constant 0 : i32
    %c0_i32_2 = arith.constant 0 : i32
    return %c0_i32, %c0_i32_0, %c0_i32_1 : i32, i32, i32
  }
  func.func @transform_3(%arg0: i32) -> (i32, i32) {
    %c0_i32 = arith.constant 0 : i32
    %c0_i32_0 = arith.constant 0 : i32
    %c0_i32_1 = arith.constant 0 : i32
    return %c0_i32, %c0_i32_0 : i32, i32
  }
  func.func @transform_4(%arg0: i32) -> (i32, i32, i32) {
    %c0_i32 = arith.constant 0 : i32
    %c0_i32_0 = arith.constant 0 : i32
    %c0_i32_1 = arith.constant 0 : i32
    %c0_i32_2 = arith.constant 0 : i32
    return %c0_i32, %c0_i32_0, %c0_i32_1 : i32, i32, i32
  }
  func.func @transform_5(%arg0: i32) -> (i32, i32) {
    %c0_i32 = arith.constant 0 : i32
    %c0_i32_0 = arith.constant 0 : i32
    %c0_i32_1 = arith.constant 0 : i32
    return %c0_i32, %c0_i32_0 : i32, i32
  }
  func.func @transform_6(%arg0: i32) -> (i32, i32) {
    %c0_i32 = arith.constant 0 : i32
    %c0_i32_0 = arith.constant 0 : i32
    %c0_i32_1 = arith.constant 0 : i32
    return %c0_i32, %c0_i32_0 : i32, i32
  }
  func.func @transform_7(%arg0: i32) -> (i32, i32) {
    %c0_i32 = arith.constant 0 : i32
    %c0_i32_0 = arith.constant 0 : i32
    %c0_i32_1 = arith.constant 0 : i32
    return %c0_i32, %c0_i32_0 : i32, i32
  }
  func.func @transform_8(%arg0: i32) -> (i32, i32, i32) {
    %c0_i32 = arith.constant 0 : i32
    %c0_i32_0 = arith.constant 0 : i32
    %c0_i32_1 = arith.constant 0 : i32
    %c0_i32_2 = arith.constant 0 : i32
    return %c0_i32, %c0_i32_0, %c0_i32_1 : i32, i32, i32
  }
  func.func @transform_9(%arg0: i32) -> (i32, i32, i32) {
    %c0_i32 = arith.constant 0 : i32
    %c0_i32_0 = arith.constant 0 : i32
    %c0_i32_1 = arith.constant 0 : i32
    %c0_i32_2 = arith.constant 0 : i32
    return %c0_i32, %c0_i32_0, %c0_i32_1 : i32, i32, i32
  }
  func.func @transform_10(%arg0: i32) -> (i32, i32) {
    %c0_i32 = arith.constant 0 : i32
    %c0_i32_0 = arith.constant 0 : i32
    %c0_i32_1 = arith.constant 0 : i32
    return %c0_i32, %c0_i32_0 : i32, i32
  }
  func.func @transform_11(%arg0: i32) -> (i32, i32, i32) {
    %c0_i32 = arith.constant 0 : i32
    %c0_i32_0 = arith.constant 0 : i32
    %c0_i32_1 = arith.constant 0 : i32
    %c0_i32_2 = arith.constant 0 : i32
    return %c0_i32, %c0_i32_0, %c0_i32_1 : i32, i32, i32
  }
  func.func @transform_12(%arg0: i32) -> (i32, i32) {
    %c0_i32 = arith.constant 0 : i32
    %c0_i32_0 = arith.constant 0 : i32
    %c0_i32_1 = arith.constant 0 : i32
    return %c0_i32, %c0_i32_0 : i32, i32
  }
  func.func @transform_13(%arg0: i32) -> (i32, i32) {
    %c0_i32 = arith.constant 0 : i32
    %c0_i32_0 = arith.constant 0 : i32
    %c0_i32_1 = arith.constant 0 : i32
    return %c0_i32, %c0_i32_0 : i32, i32
  }
  func.func @transform_14(%arg0: i32) -> (i32, i32) {
    %c0_i32 = arith.constant 0 : i32
    %c0_i32_0 = arith.constant 0 : i32
    %c0_i32_1 = arith.constant 0 : i32
    return %c0_i32, %c0_i32_0 : i32, i32
  }
  func.func @transform_15(%arg0: i32) -> (i32, i32) {
    %c0_i32 = arith.constant 0 : i32
    %c0_i32_0 = arith.constant 0 : i32
    %c0_i32_1 = arith.constant 0 : i32
    return %c0_i32, %c0_i32_0 : i32, i32
  }
  func.func @transform_16(%arg0: i32) -> (i32, i32, i32) {
    %c0_i32 = arith.constant 0 : i32
    %c0_i32_0 = arith.constant 0 : i32
    %c0_i32_1 = arith.constant 0 : i32
    %c0_i32_2 = arith.constant 0 : i32
    return %c0_i32, %c0_i32_0, %c0_i32_1 : i32, i32, i32
  }
  func.func @transform_17(%arg0: i32) -> (i32, i32) {
    %c0_i32 = arith.constant 0 : i32
    %c0_i32_0 = arith.constant 0 : i32
    %c0_i32_1 = arith.constant 0 : i32
    return %c0_i32, %c0_i32_0 : i32, i32
  }
  func.func @transform_18(%arg0: i32) -> (i32, i32) {
    %c0_i32 = arith.constant 0 : i32
    %c0_i32_0 = arith.constant 0 : i32
    %c0_i32_1 = arith.constant 0 : i32
    return %c0_i32, %c0_i32_0 : i32, i32
  }
  func.func @transform_19(%arg0: i32) -> (i32, i32) {
    %c0_i32 = arith.constant 0 : i32
    %c0_i32_0 = arith.constant 0 : i32
    %c0_i32_1 = arith.constant 0 : i32
    return %c0_i32, %c0_i32_0 : i32, i32
  }
  func.func @transform_20(%arg0: i32) -> (i32, i32) {
    %c0_i32 = arith.constant 0 : i32
    %c0_i32_0 = arith.constant 0 : i32
    %c0_i32_1 = arith.constant 0 : i32
    return %c0_i32, %c0_i32_0 : i32, i32
  }
  func.func @transform_21(%arg0: i32) -> (i32, i32, i32) {
    %c0_i32 = arith.constant 0 : i32
    %c0_i32_0 = arith.constant 0 : i32
    %c0_i32_1 = arith.constant 0 : i32
    return %arg0, %c0_i32, %c0_i32_0 : i32, i32, i32
  }
}

</mosaic_0001>

<bundles_post_ra>
// kernel: tile.23
= control target key start
LH: loop header
LB: loop body
LE: loop exit
PB: predicated region body
PF: predicated region fallthrough
CT: control target
= control target key end

     0   :  { %s28_s0 = inlined_call_operand.vmem [shape: f32[8], index: 0, kind: input, shape index: {}]   ;;  %s29_s1 = inlined_call_operand.vmem [shape: f32[16,8], index: 1, kind: output, shape index: {}]  }
   0x1   :  { %v4_v0 = vld [vmem:[%s28_s0] ss:$0 sm:$0xff] }
   0x2   :  { %5 = vst [vmem:[%s29_s1] sm:$0xff] %v4_v0  ;;  %8 = vst [vmem:[%s29_s1 + $0x8] sm:$0xff] %v4_v0 }

// kernel: tile.24
= control target key start
LH: loop header
LB: loop body
LE: loop exit
PB: predicated region body
PF: predicated region fallthrough
CT: control target
= control target key end

     0   :  { %s131_s10 = smov 120   ;;  %s132_s11 = smov 104   ;;  %vm3_vm0 = vcmask 64512   ;;  %vm9_vm1 = vcmask 1048512   ;;  %vm15_vm2 = vcmask 982912   ;;  %vm21_vm3 = vcmask 917312   ;;  %s207_s0 = inlined_call_operand.vmem [shape: f32[16,8], index: 0, kind: input, shape index: {}]   ;;  %s208_s1 = inlined_call_operand.vmem [shape: f32[1,128], index: 1, kind: output, shape index: {}]  }
   0x1   :  { %v101_v0 = vld [vmem:[%s207_s0 + $0xf] sm:$0x1]   ;;  %v103_v1 = vld [vmem:[%s207_s0 + $0xd] sm:$0x1]   ;;  %v102_v2 = vld [vmem:[%s207_s0 + $0xe] sm:$0x1]  }
   0x2   :  { %7 = vrot.lane.b32.xlu0 %v101_v0, %s131_s10  ;;  %19 = vrot.lane.b32.xlu1 %v103_v1, %s132_s11  ;;  %v104_v3 = vld [vmem:[%s207_s0 + $0xc] sm:$0x1]   ;;  %s133_s16 = smov 112   ;;  %s134_s17 = smov 96   ;;  %v105_v4 = vld [vmem:[%s207_s0 + $0xb] sm:$0x1]  }
   0x3   :  { %v106_v5 = vld [vmem:[%s207_s0 + $0xa] sm:$0x1]   ;;  %v2_v6 = vld [vmem:[%s207_s0] sm:$0x1]   ;;  %s135_s24 = smov 88   ;;  %s136_s25 = smov 80  }
   0x4   :  { %4 = vst.msk [vmem:[#allocation0] sm:$0x1] %vm3_vm0, %v2_v6   ;;  %v107_v7 = vld [vmem:[%s207_s0 + $0x9] sm:$0x1]   ;;  %v108_v8 = vld [vmem:[%s207_s0 + $0x8] sm:$0x1]  }
   0x5   :  { %s137_s30 = smov 72   ;;  %s138_s2 = smov 64   ;;  %v109_v9 = vld [vmem:[%s207_s0 + $0x7] sm:$0x1]   ;;  %v110_v10 = vld [vmem:[%s207_s0 + $0x6] sm:$0x1]  }
   0x6   :  { %13 = vrot.lane.b32.xlu0 %v102_v2, %s133_s16  ;;  %25 = vrot.lane.b32.xlu1 %v104_v3, %s134_s17  ;;  %s139_s7 = smov 56   ;;  %s140_s8 = smov 48   ;;  %v111_v11 = vld [vmem:[%s207_s0 + $0x5] sm:$0x1]   ;;  %v112_v12 = vld [vmem:[%s207_s0 + $0x4] sm:$0x1]  }
   0x7   :  { %s141_s13 = smov 40   ;;  %s142_s14 = smov 32   ;;  %v113_v13 = vld [vmem:[%s207_s0 + $0x3] sm:$0x1]   ;;  %v114_v14 = vld [vmem:[%s207_s0 + $0x2] sm:$0x1]  }
   0x8   :  { %s143_s19 = smov 24   ;;  %s144_s20 = smov 16   ;;  %v115_v15 = vld [vmem:[%s207_s0 + $0x1] sm:$0x1]   ;;  %vm27_vm4 = vcmask 851712   ;;  %vm33_vm5 = vcmask 786112  }
   0x9   :  { %s145_s0 = smov 8   ;;  %vm39_vm6 = vcmask 720512   ;;  %vm45_vm7 = vcmask 654912   ;;  %vm51_vm8 = vcmask 589312   ;;  %vm57_vm9 = vcmask 523712  }
   0xa   :  { %31 = vrot.lane.b32.xlu0 %v105_v4, %s135_s24  ;;  %37 = vrot.lane.b32.xlu1 %v106_v5, %s136_s25  ;;  %vm63_vm10 = vcmask 458112   ;;  %vm69_vm11 = vcmask 392512   ;;  %vm75_vm12 = vcmask 326912   ;;  %vm81_vm13 = vcmask 261312  }
   0xb   :  { %vm87_vm14 = vcmask 195712   ;;  %vm93_vm15 = vcmask 130112  }
   0xe   :  { %43 = vrot.lane.b32.xlu0 %v107_v7, %s137_s30  ;;  %49 = vrot.lane.b32.xlu1 %v108_v8, %s138_s2 }
  0x12   :  { %55 = vrot.lane.b32.xlu0 %v109_v9, %s139_s7  ;;  %61 = vrot.lane.b32.xlu1 %v110_v10, %s140_s8 }
  0x16   :  { %67 = vrot.lane.b32.xlu0 %v111_v11, %s141_s13  ;;  %73 = vrot.lane.b32.xlu1 %v112_v12, %s142_s14 }
  0x1a   :  { %79 = vrot.lane.b32.xlu0 %v113_v13, %s143_s19  ;;  %85 = vrot.lane.b32.xlu1 %v114_v14, %s144_s20 }
  0x1e   :  { %91 = vrot.lane.b32.xlu0 %v115_v15, %s145_s0 }
  0x74   :  { %v8_v16 = vpop.permute.xlu0 %7   ;;  %v20_v17 = vpop.permute.xlu1 %19  }
  0x75   :  { %10 = vst.msk [vmem:[#allocation0] sm:$0x1] %vm9_vm1, %v8_v16  }
  0x78   :  { %v14_v18 = vpop.permute.xlu0 %13   ;;  %v26_v19 = vpop.permute.xlu1 %25  }
  0x79   :  { %16 = vst.msk [vmem:[#allocation0] sm:$0x1] %vm15_vm2, %v14_v18  }
  0x7a   :  { %22 = vst.msk [vmem:[#allocation0] sm:$0x1] %vm21_vm3, %v20_v17  }
  0x7b   :  { %28 = vst.msk [vmem:[#allocation0] sm:$0x1] %vm27_vm4, %v26_v19  }
  0x7c   :  { %v32_v20 = vpop.permute.xlu0 %31   ;;  %v38_v21 = vpop.permute.xlu1 %37  }
  0x7d   :  { %34 = vst.msk [vmem:[#allocation0] sm:$0x1] %vm33_vm5, %v32_v20  }
  0x7e   :  { %40 = vst.msk [vmem:[#allocation0] sm:$0x1] %vm39_vm6, %v38_v21  }
  0x80   :  { %v44_v22 = vpop.permute.xlu0 %43   ;;  %v50_v23 = vpop.permute.xlu1 %49  }
  0x81   :  { %46 = vst.msk [vmem:[#allocation0] sm:$0x1] %vm45_vm7, %v44_v22  }
  0x82   :  { %52 = vst.msk [vmem:[#allocation0] sm:$0x1] %vm51_vm8, %v50_v23  }
  0x84   :  { %v56_v24 = vpop.permute.xlu0 %55   ;;  %v62_v25 = vpop.permute.xlu1 %61  }
  0x85   :  { %58 = vst.msk [vmem:[#allocation0] sm:$0x1] %vm57_vm9, %v56_v24  }
  0x86   :  { %64 = vst.msk [vmem:[#allocation0] sm:$0x1] %vm63_vm10, %v62_v25  }
  0x88   :  { %v68_v26 = vpop.permute.xlu0 %67   ;;  %v74_v27 = vpop.permute.xlu1 %73  }
  0x89   :  { %70 = vst.msk [vmem:[#allocation0] sm:$0x1] %vm69_vm11, %v68_v26  }
  0x8a   :  { %76 = vst.msk [vmem:[#allocation0] sm:$0x1] %vm75_vm12, %v74_v27  }
  0x8c   :  { %v80_v28 = vpop.permute.xlu0 %79   ;;  %v86_v29 = vpop.permute.xlu1 %85  }
  0x8d   :  { %82 = vst.msk [vmem:[#allocation0] sm:$0x1] %vm81_vm13, %v80_v28  }
  0x8e   :  { %88 = vst.msk [vmem:[#allocation0] sm:$0x1] %vm87_vm14, %v86_v29  }
  0x90   :  { %v92_v30 = vpop.permute.xlu0 %91  }
  0x91   :  { %94 = vst.msk [vmem:[#allocation0] sm:$0x1] %vm93_vm15, %v92_v30  }
  0x98   :  { %v98_v31 = vld [vmem:[#allocation0] sm:$0x1] }
  0x99   :  { %100 = vst [vmem:[%s208_s1] sm:$0x1] %v98_v31 }

// kernel: tile.33
= control target key start
LH: loop header
LB: loop body
LE: loop exit
PB: predicated region body
PF: predicated region fallthrough
CT: control target
= control target key end

     0   :  { %s22_s0 = inlined_call_operand.vmem [shape: f32[16], index: 0, kind: input, shape index: {}]   ;;  %s23_s1 = inlined_call_operand.vmem [shape: f32[8,16], index: 1, kind: output, shape index: {}]  }
   0x1   :  { %v4_v0 = vld [vmem:[%s22_s0] ss:$0 sm:$0xff] }
   0x2   :  { %5 = vst [vmem:[%s23_s1] sm:$0xff] %v4_v0 }

// kernel: tile.34
= control target key start
LH: loop header
LB: loop body
LE: loop exit
PB: predicated region body
PF: predicated region fallthrough
CT: control target
= control target key end

     0   :  { %s67_s10 = smov 112   ;;  %s68_s11 = smov 80   ;;  %vm3_vm0 = vcmask 130048   ;;  %vm9_vm1 = vcmask 1048448   ;;  %vm15_vm2 = vcmask 917248   ;;  %vm21_vm3 = vcmask 786048   ;;  %s111_s0 = inlined_call_operand.vmem [shape: f32[8,16], index: 0, kind: input, shape index: {}]   ;;  %s112_s1 = inlined_call_operand.vmem [shape: f32[1,128], index: 1, kind: output, shape index: {}]  }
   0x1   :  { %v53_v0 = vld [vmem:[%s111_s0 + $0x7] sm:$0x1]   ;;  %v55_v1 = vld [vmem:[%s111_s0 + $0x5] sm:$0x1]   ;;  %v54_v2 = vld [vmem:[%s111_s0 + $0x6] sm:$0x1]  }
   0x2   :  { %7 = vrot.lane.b32.xlu0 %v53_v0, %s67_s10  ;;  %19 = vrot.lane.b32.xlu1 %v55_v1, %s68_s11  ;;  %v56_v3 = vld [vmem:[%s111_s0 + $0x4] sm:$0x1]   ;;  %v2_v4 = vld [vmem:[%s111_s0] sm:$0x1]   ;;  %s69_s18 = smov 96   ;;  %s70_s19 = smov 64  }
   0x3   :  { %4 = vst.msk [vmem:[#allocation0] sm:$0x1] %vm3_vm0, %v2_v4   ;;  %v57_v5 = vld [vmem:[%s111_s0 + $0x3] sm:$0x1]   ;;  %v58_v6 = vld [vmem:[%s111_s0 + $0x2] sm:$0x1]  }
   0x4   :  { %s71_s24 = smov 48   ;;  %s72_s25 = smov 32   ;;  %v59_v7 = vld [vmem:[%s111_s0 + $0x1] sm:$0x1]   ;;  %vm27_vm4 = vcmask 654848   ;;  %vm33_vm5 = vcmask 523648  }
   0x5   :  { %s73_s0 = smov 16   ;;  %vm39_vm6 = vcmask 392448   ;;  %vm45_vm7 = vcmask 261248  }
   0x6   :  { %13 = vrot.lane.b32.xlu0 %v54_v2, %s69_s18  ;;  %25 = vrot.lane.b32.xlu1 %v56_v3, %s70_s19 }
   0xa   :  { %31 = vrot.lane.b32.xlu0 %v57_v5, %s71_s24  ;;  %37 = vrot.lane.b32.xlu1 %v58_v6, %s72_s25 }
   0xe   :  { %43 = vrot.lane.b32.xlu0 %v59_v7, %s73_s0 }
  0x74   :  { %v8_v8 = vpop.permute.xlu0 %7   ;;  %v20_v9 = vpop.permute.xlu1 %19  }
  0x75   :  { %10 = vst.msk [vmem:[#allocation0] sm:$0x1] %vm9_vm1, %v8_v8  }
  0x78   :  { %v14_v10 = vpop.permute.xlu0 %13   ;;  %v26_v11 = vpop.permute.xlu1 %25  }
  0x79   :  { %16 = vst.msk [vmem:[#allocation0] sm:$0x1] %vm15_vm2, %v14_v10  }
  0x7a   :  { %22 = vst.msk [vmem:[#allocation0] sm:$0x1] %vm21_vm3, %v20_v9  }
  0x7b   :  { %28 = vst.msk [vmem:[#allocation0] sm:$0x1] %vm27_vm4, %v26_v11  }
  0x7c   :  { %v32_v12 = vpop.permute.xlu0 %31   ;;  %v38_v13 = vpop.permute.xlu1 %37  }
  0x7d   :  { %34 = vst.msk [vmem:[#allocation0] sm:$0x1] %vm33_vm5, %v32_v12  }
  0x7e   :  { %40 = vst.msk [vmem:[#allocation0] sm:$0x1] %vm39_vm6, %v38_v13  }
  0x80   :  { %v44_v14 = vpop.permute.xlu0 %43  }
  0x81   :  { %46 = vst.msk [vmem:[#allocation0] sm:$0x1] %vm45_vm7, %v44_v14  }
  0x88   :  { %v50_v15 = vld [vmem:[#allocation0] sm:$0x1] }
  0x89   :  { %52 = vst [vmem:[%s112_s1] sm:$0x1] %v50_v15 }

// kernel: _conv_encoder_forward.1
= control target key start
LH: loop header
LB: loop body
LE: loop exit
PB: predicated region body
PF: predicated region fallthrough
CT: control target
= control target key end

     0   :  { %s5133_s0 = inlined_call_operand.vmem [shape: f32[64,64], index: 0, kind: input, shape index: {}]   ;;  %s5134_s1 = inlined_call_operand.vmem [shape: f32[3,32,1], index: 1, kind: input, shape index: {}]   ;;  %s5135_s2 = inlined_call_operand.vmem [shape: f32[3,64,128], index: 2, kind: input, shape index: {}]   ;;  %s5136_s3 = inlined_call_operand.vmem [shape: f32[1,128], index: 3, kind: input, shape index: {}]   ;;  %s5137_s4 = inlined_call_operand.vmem [shape: f32[3,128,128], index: 4, kind: input, shape index: {}]   ;;  %s5138_s5 = inlined_call_operand.vmem [shape: f32[1,128], index: 5, kind: input, shape index: {}]   ;;  %s5139_s6 = inlined_call_operand.vmem [shape: f32[16,32], index: 6, kind: input, shape index: {}]   ;;  %s5140_s7 = inlined_call_operand.vmem [shape: f32[128,64], index: 7, kind: input, shape index: {}]   ;;  %s5141_s8 = inlined_call_operand.vmem [shape: f32[3,16,1], index: 8, kind: input, shape index: {}]   ;;  %s5142_s9 = inlined_call_operand.vmem [shape: f32[3,64,128], index: 9, kind: input, shape index: {}]   ;;  %s5143_s10 = inlined_call_operand.vmem [shape: f32[1,128], index: 10, kind: input, shape index: {}]   ;;  %s5144_s11 = inlined_call_operand.vmem [shape: f32[3,128,128], index: 11, kind: input, shape index: {}]   ;;  %s5145_s12 = inlined_call_operand.vmem [shape: f32[1,128], index: 12, kind: input, shape index: {}]   ;;  %s5146_s13 = inlined_call_operand.vmem [shape: f32[8,16], index: 13, kind: input, shape index: {}]   ;;  %s5147_s14 = inlined_call_operand.vmem [shape: f32[128,64], index: 14, kind: input, shape index: {}]   ;;  %s5148_s15 = inlined_call_operand.vmem [shape: f32[64,256], index: 15, kind: input, shape index: {}]   ;;  %s5149_s16 = inlined_call_operand.vmem [shape: f32[4,8,1], index: 16, kind: input, shape index: {}]   ;;  %s5150_s17 = inlined_call_operand.vmem [shape: f32[2,8], index: 17, kind: input, shape index: {}]   ;;  %s5151_s18 = inlined_call_operand.vmem [shape: f32[1,64], index: 18, kind: input, shape index: {}]   ;;  %s5152_s19 = inlined_call_operand.vmem [shape: f32[64,32], index: 19, kind: input, shape index: {}]   ;;  %s5153_s20 = inlined_call_operand.vmem [shape: f32[1,32], index: 20, kind: input, shape index: {}]   ;;  %s5154_s21 = inlined_call_operand.vmem [shape: f32[2,2,32], index: 21, kind: output, shape index: {}]  }
   0x1   :  { %5159 = sst [smem:[#allocation3_spill]] %s5133_s0 }
   0x2   :  { %5160 = sst [smem:[#allocation4_spill]] %s5134_s1 }
   0x3   :  { %5161 = sst [smem:[#allocation5_spill]] %s5135_s2  ;;  %s4208_s2 = smov 0  }
   0x4   :  { %5162 = sst [smem:[#allocation6_spill]] %s5136_s3 }
   0x5   :  { %5163 = sst [smem:[#allocation7_spill]] %s5137_s4 }
   0x6   :  { %5164 = sst [smem:[#allocation8_spill]] %s5138_s5 }
   0x7 LB: > { %5165 = sst [smem:[#allocation2_spill]] %s4089_s2  ;;  %s4214_s25 = sadd.s32 4294967295, %s4089_s2   ;;  %s4089_s2 = sphi %s4208_s2, %s31_s2  }
   0x8   : > { %p2802_p0 = scmp.ge.s32.totalorder %s4089_s2, 1  ;;  %p588_p1 = scmp.lt.s32.totalorder %s4089_s2, 3 }
   0xa   : > { %p589_p2 = pnand %p2802_p0, %p588_p1 }
   0xb   : > { %s5166_s3 = sld [smem:[#allocation4_spill]] (!%p589_p2)  ;;  %v4091_v2 = vmov (!%p589_p2), 0   ;;  %s5167_s1 = sld [smem:[#allocation5_spill]] (!%p589_p2)  ;;  %v666_v36 = vlaneseq (!%p589_p2)  ;;  %vm709_vm1 = vcmask (!%p589_p2), 523264   ;;  %vm1465_vm3 = vcmask (!%p589_p2), 261120  }
   0xc   : > { %592 = sbr.rel (%p589_p2) target bundleno = 3134 (0xc3e), region = 104  ;;  %4067 = vset.pattern.permute.xlu1 (!%p589_p2), %v4091_v2  ;;  %4066 = vset.pattern.permute.xlu0 (!%p589_p2), %v4091_v2  ;;  %s5168_s28 = sld [smem:[#allocation7_spill]] (!%p589_p2)  ;;  %vm4094_vm4 = vmmov (!%p589_p2), 0   ;;  %vm2278_vm5 = vcmask (!%p589_p2), 130048   ;;  %vm2579_vm7 = vcmask (!%p589_p2), 64512   ;;  %vm2743_vm8 = vcmask (!%p589_p2), 254976  }
   0xd   : > { %s2803_s30 = sshll.u32 (!%p589_p2), %s4214_s25, 2  ;;  %s5169_s24 = sld [smem:[#allocation3_spill]] (!%p589_p2)  ;;  %v4301_v37 = vshrl.u32 (!%p589_p2), %v666_v36, 7 }
   0xe   : > { %p648_p3 = scmp.lt.s32.totalorder (!%p589_p2), %s2803_s30, 7  ;;  %s5171_s0 = sld [smem:[#allocation8_spill]] (!%p589_p2) }
   0xf   : > { %vm668_vm0 = vcmp.lt.s32.totalorder (!%p589_p2), %v4301_v37, 1  ;;  %vm931_vm2 = vcmp.lt.s32.totalorder (!%p589_p2), %v4301_v37, 7  ;;  %s4097_s23 = smov (!%p589_p2), 64   ;;  %p653_p4 = scmp.lt.s32.totalorder (!%p589_p2), %s4214_s25, 1 }
  0x11   : > { %v675_v0 = vld [vmem:[%s5166_s3 + $0x10] sm:$0xff] (!%p589_p2)  ;;  %v673_v1 = vld [vmem:[%s5166_s3] sm:$0xff] (!%p589_p2)  ;;  %v676_v3 = vld [vmem:[%s5166_s3 + $0x18] sm:$0xff] (!%p589_p2) }
  0x12   : > { %689 = vperm.xlu1 (!%p589_p2), %4067, %v675_v0   ;;  %679 = vperm.xlu0 (!%p589_p2), %4066, %v673_v1   ;;  %v674_v4 = vld [vmem:[%s5166_s3 + $0x8] sm:$0xff] (!%p589_p2)  ;;  %v701_v5 = vld [vmem:[%s5167_s1] sm:$0xff] (!%p589_p2)  ;;  %v703_v7 = vld [vmem:[%s5167_s1 + $0x10] sm:$0xff] (!%p589_p2) }
  0x13   : > { %v702_v6 = vld [vmem:[%s5167_s1 + $0x8] sm:$0xff]  ;;  %v704_v8 = vld [vmem:[%s5167_s1 + $0x18] sm:$0xff]  ;;  %v705_v11 = vld [vmem:[%s5167_s1 + $0x20] sm:$0xff]  ;;  %s5174_s30 = smov (!%p648_p3, %s2803_s30), 7  ;;  %s5176_s25 = smov (!%p653_p4, %s4214_s25), 1 }
  0x14   : > { %v3632_v9 = vpack.c.bf16 %v702_v6, %v701_v5  ;;  %v3636_v10 = vpack.c.bf16 %v704_v8, %v703_v7  ;;  %v706_v12 = vld [vmem:[%s5167_s1 + $0x28] sm:$0xff]  ;;  %v2823_v14 = vld [vmem:[%s5166_s3 + $0x40] sm:$0xff]  ;;  %v707_v16 = vld [vmem:[%s5167_s1 + $0x30] sm:$0xff]  ;;  %s2804_s5 = sshll.u32 %s5174_s30, 3  ;;  %s2805_s22 = sshll.u32 %s5176_s25, 1 }
  0x15   : > { %v2824_v13 = vld [vmem:[%s5166_s3 + $0x48] sm:$0xff]  ;;  %v3640_v15 = vpack.c.bf16 %v706_v12, %v705_v11  ;;  %v708_v17 = vld [vmem:[%s5167_s1 + $0x38] sm:$0xff]  ;;  %v2825_v19 = vld [vmem:[%s5166_s3 + $0x50] sm:$0xff]  ;;  %s651_s26 = scalar_lea.vmem %s5169_s24, %s2804_s5  ;;  %s5170_s5 = sld [smem:[#allocation6_spill]] }
  0x16   : > { %694 = vperm.xlu1 %4067, %v676_v3   ;;  %684 = vperm.xlu0 %4066, %v674_v4   ;;  %v2826_v18 = vld [vmem:[%s5166_s3 + $0x58] sm:$0xff]  ;;  %v3644_v20 = vpack.c.bf16 %v708_v17, %v707_v16  ;;  %v2811_v21 = vld [vmem:[%s5167_s1 + $0x40] sm:$0xff]  ;;  %v2812_v22 = vld [vmem:[%s5167_s1 + $0x48] sm:$0xff]  ;;  %s656_s27 = scalar_lea.vmem %s5154_s21, %s2805_s22 }
  0x17   : > { %3633 = vmatprep.subr.bf16.mxu0 %v3632_v9  ;;  %v3648_v23 = vpack.c.bf16 %v2812_v22, %v2811_v21  ;;  %v1096_v24 = vld [vmem:[%s5168_s28] sm:$0xff]  ;;  %v1097_v25 = vld [vmem:[%s5168_s28 + $0x8] sm:$0xff]  ;;  %v1098_v26 = vld [vmem:[%s5168_s28 + $0x10] sm:$0xff] }
  0x18   : > { %3635 = vmatpush3.bf16.msra.mxu0 %v3632_v9  ;;  %v3680_v27 = vpack.c.bf16 %v1097_v25, %v1096_v24  ;;  %v1099_v28 = vld [vmem:[%s5168_s28 + $0x18] sm:$0xff]  ;;  %v1100_v30 = vld [vmem:[%s5168_s28 + $0x20] sm:$0xff]  ;;  %v1101_v31 = vld [vmem:[%s5168_s28 + $0x28] sm:$0xff] }
  0x19   : > { %3637 = vmatprep.subr.bf16.mxu0 %v3636_v10  ;;  %v3684_v29 = vpack.c.bf16 %v1099_v28, %v1098_v26  ;;  %v3688_v32 = vpack.c.bf16 %v1101_v31, %v1100_v30  ;;  %v1102_v33 = vld [vmem:[%s5168_s28 + $0x30] sm:$0xff]  ;;  %v1103_v34 = vld [vmem:[%s5168_s28 + $0x38] sm:$0xff]  ;;  %v4303_v38 = vld [vmem:[%s651_s26] sm:$0xff] }
  0x1a   : > { %948 = vperm.xlu1 %4067, %v2824_v13   ;;  %943 = vperm.xlu0 %4066, %v2823_v14   ;;  %v3692_v35 = vpack.c.bf16 %v1103_v34, %v1102_v33  ;;  %v4305_v39 = vld [vmem:[%s651_s26 + $0x18] sm:$0xff]  ;;  %v4307_v40 = vld [vmem:[%s651_s26 + $0x10] sm:$0xff]  ;;  %v662_v41 = vrot.slane %v4303_v38, 7  ;;  %v4311_v43 = vld [vmem:[%s651_s26 + $0x8] sm:$0xff]  ;;  %v927_v9 = vrot.slane %v4303_v38, 1 }
  0x1b   : > { %3681 = vmatprep.subr.bf16.mxu1 %v3680_v27  ;;  %v665_v42 = vrot.slane %v4305_v39, 7  ;;  %v664_v44 = vrot.slane %v4307_v40, 7  ;;  %v663_v45 = vrot.slane %v4311_v43, 7  ;;  %v2813_v52 = vld [vmem:[%s5167_s1 + $0x50] sm:$0xff]  ;;  %v2814_v53 = vld [vmem:[%s5167_s1 + $0x58] sm:$0xff]  ;;  %v2815_v60 = vld [vmem:[%s5167_s1 + $0x60] sm:$0xff] }
  0x1c   : > { %3639 = vmatpush3.bf16.msra.mxu0 %v3636_v10  ;;  %3683 = vmatpush3.bf16.msra.mxu1 %v3680_v27  ;;  %v3652_v58 = vpack.c.bf16 %v2814_v53, %v2813_v52  ;;  %v2816_v61 = vld [vmem:[%s5167_s1 + $0x68] sm:$0xff]  ;;  %v2817_v0 = vld [vmem:[%s5167_s1 + $0x70] sm:$0xff]  ;;  %v2818_v1 = vld [vmem:[%s5167_s1 + $0x78] sm:$0xff]  ;;  %v928_v8 = vrot.slane %v4311_v43, 1  ;;  %v930_v21 = vrot.slane %v4305_v39, 1 }
  0x1d   : > { %3641 = vmatprep.subr.bf16.mxu0 %v3640_v15  ;;  %3685 = vmatprep.subr.bf16.mxu1 %v3684_v29  ;;  %v672_v46 = vsel %vm668_vm0, %v665_v42, %v662_v41  ;;  %v670_v49 = vsel %vm668_vm0, %v663_v45, %v664_v44  ;;  %v671_v51 = vsel %vm668_vm0, %v662_v41, %v663_v45  ;;  %v2827_v3 = vld [vmem:[%s5167_s1 + $0x80] sm:$0xff]  ;;  %v2828_v4 = vld [vmem:[%s5167_s1 + $0x88] sm:$0xff]  ;;  %v2829_v6 = vld [vmem:[%s5167_s1 + $0x90] sm:$0xff] }
  0x1e   : > { %958 = vperm.xlu1 %4067, %v2826_v18   ;;  %953 = vperm.xlu0 %4066, %v2825_v19   ;;  %v669_v55 = vsel %vm668_vm0, %v664_v44, %v665_v42  ;;  %v3656_v63 = vpack.c.bf16 %v2816_v61, %v2815_v60  ;;  %v3660_v2 = vpack.c.bf16 %v2818_v1, %v2817_v0  ;;  %v2830_v7 = vld [vmem:[%s5167_s1 + $0x98] sm:$0xff]  ;;  %v2831_v11 = vld [vmem:[%s5167_s1 + $0xa0] sm:$0xff]  ;;  %v2832_v12 = vld [vmem:[%s5167_s1 + $0xa8] sm:$0xff] }
  0x1f   : > { %v3664_v5 = vpack.c.bf16 %v2828_v4, %v2827_v3  ;;  %v3668_v10 = vpack.c.bf16 %v2830_v7, %v2829_v6  ;;  %v934_v14 = vsel %vm931_vm2, %v927_v9, %v928_v8  ;;  %v2833_v17 = vld [vmem:[%s5167_s1 + $0xb0] sm:$0xff]  ;;  %v2834_v18 = vld [vmem:[%s5167_s1 + $0xb8] sm:$0xff]  ;;  %v935_v28 = vsel %vm931_vm2, %v930_v21, %v927_v9  ;;  %v1104_v31 = vld [vmem:[%s5168_s28 + $0x40] sm:$0xff] }
  0x20   : > { %3643 = vmatpush3.bf16.msra.mxu0 %v3640_v15  ;;  %3687 = vmatpush3.bf16.msra.mxu1 %v3684_v29  ;;  %v3672_v15 = vpack.c.bf16 %v2832_v12, %v2831_v11  ;;  %v3676_v19 = vpack.c.bf16 %v2834_v18, %v2833_v17  ;;  %v1106_v34 = vld [vmem:[%s5168_s28 + $0x50] sm:$0xff]  ;;  %v2840_v45 = vld [vmem:[%s5168_s28 + $0x80] sm:$0xff]  ;;  %v2843_v17 = vld [vmem:[%s5168_s28 + $0x98] sm:$0xff] }
  0x21   : > { %3645 = vmatprep.subr.bf16.mxu0 %v3644_v20  ;;  %3689 = vmatprep.subr.bf16.mxu1 %v3688_v32  ;;  %v1110_v42 = vld [vmem:[%s5168_s28 + $0x70] sm:$0xff] }
  0x24   : > { %3647 = vmatpush3.bf16.msra.mxu0 %v3644_v20  ;;  %3691 = vmatpush3.bf16.msra.mxu1 %v3688_v32  ;;  %v929_v20 = vrot.slane %v4307_v40, 1  ;;  %v1105_v32 = vld [vmem:[%s5168_s28 + $0x48] sm:$0xff] }
  0x25   : > { %3649 = vmatprep.subr.bf16.mxu0 %v3648_v23  ;;  %3693 = vmatprep.subr.bf16.mxu1 %v3692_v35  ;;  %v3696_v33 = vpack.c.bf16 %v1105_v32, %v1104_v31  ;;  %v2845_v31 = vld [vmem:[%s5168_s28 + $0xa8] sm:$0xff]  ;;  %v2846_v32 = vld [vmem:[%s5168_s28 + $0xb0] sm:$0xff] }
  0x26   : > { %v932_v25 = vsel %vm931_vm2, %v929_v20, %v930_v21 }
  0x28   : > { %3695 = vmatpush3.bf16.msra.mxu1 %v3692_v35  ;;  %v1107_v35 = vld [vmem:[%s5168_s28 + $0x58] sm:$0xff] }
  0x29   : > { %3697 = vmatprep.subr.bf16.mxu1 %v3696_v33 }
  0x2c   : > { %3699 = vmatpush3.bf16.msra.mxu1 %v3696_v33  ;;  %v2847_v33 = vld [vmem:[%s5168_s28 + $0xb8] sm:$0xff] }
  0x91   : > { %v4318_v47 = vpop.permute.xlu1 %689  ;;  %v4320_v48 = vpop.permute.xlu0 %679 }
  0x92   : > { %v697_v50 = vmul.f32 %v4320_v48, %v672_v46  ;;  %v699_v54 = vmul.f32 %v4318_v47, %v670_v49  ;;  %v2841_v46 = vld [vmem:[%s5168_s28 + $0x88] sm:$0xff] }
  0x93   : > { %v3712_v49 = vpack.c.bf16 %v2841_v46, %v2840_v45  ;;  %v2854_v45 = vld [vmem:[%s5168_s28 + $0xf0] sm:$0xff]  ;;  %v2855_v46 = vld [vmem:[%s5168_s28 + $0xf8] sm:$0xff] }
  0x94   : > { %3194 = vmatprep.mubr.msk.f32.mxu0 %vm709_vm1, %v697_v50  ;;  %v2810_v50 = vld [vmem:[%s5170_s5] ss:$0 sm:$0xff]  ;;  %s4092_s5 = smov 120  }
  0x95   : > { %v4337_v56 = vpop.permute.xlu0 %684  ;;  %v4340_v59 = vpop.permute.xlu1 %694 }
  0x96   : > { %v698_v57 = vmul.f32 %v4337_v56, %v671_v51  ;;  %v700_v62 = vmul.f32 %v4340_v59, %v669_v55 }
  0x98   : > { %3195 = vmatmul.mubr.msk.f32.vlgmr.msra.gmra.mrb[0].mxu0 %vm709_vm1, %v698_v57 }
  0x99   : > { %3651 = vmatpush3.bf16.msra.mxu0 %v3648_v23  ;;  %3197 = vmatprep.mubr.msk.f32.mxu0 %vm709_vm1, %v699_v54  ;;  %v4381_v13 = vpop.permute.xlu0 %943  ;;  %v4401_v22 = vpop.permute.xlu1 %948  ;;  %v933_v23 = vsel %vm931_vm2, %v928_v8, %v929_v20 }
  0x9a   : > { %3653 = vmatprep.subr.bf16.mxu0 %v3652_v58  ;;  %v961_v16 = vmul.f32 %v4381_v13, %v934_v14  ;;  %v962_v26 = vmul.f32 %v4401_v22, %v933_v23 }
  0x9c   : > { %3198 = vmatmul.mubr.msk.f32.gmra.mrb[2].mxu0 %vm709_vm1, %v700_v62 }
  0x9d   : > { %3655 = vmatpush3.bf16.msra.mxu0 %v3652_v58  ;;  %3216 = vmatprep.mubr.msk.f32.mxu0 %vm709_vm1, %v4303_v38  ;;  %v4405_v24 = vpop.permute.xlu0 %953  ;;  %v4410_v27 = vpop.permute.xlu1 %958  ;;  %v3700_v38 = vpack.c.bf16 %v1107_v35, %v1106_v34  ;;  %v3724_v34 = vpack.c.bf16 %v2847_v33, %v2846_v32  ;;  %v2848_v35 = vld [vmem:[%s5168_s28 + $0xc0] sm:$0xff] }
  0x9e   : > { %3657 = vmatprep.subr.bf16.mxu0 %v3656_v63  ;;  %v963_v29 = vmul.f32 %v4405_v24, %v932_v25  ;;  %v964_v30 = vmul.f32 %v4410_v27, %v935_v28 }
  0x9f   : > { %3701 = vmatprep.subr.bf16.mxu1 %v3700_v38 }
  0xa0   : > { %3703 = vmatpush3.bf16.msra.mxu1 %v3700_v38 }
  0xa1   : > { %3659 = vmatpush3.bf16.msra.mxu0 %v3656_v63 }
  0xa2   : > { %3661 = vmatprep.subr.bf16.mxu0 %v3660_v2 }
  0xa5   : > { %3663 = vmatpush3.bf16.msra.mxu0 %v3660_v2 }
  0xa6   : > { %3665 = vmatprep.subr.bf16.mxu0 %v3664_v5 }
  0xa8   : > { %3217 = vmatmul.mubr.msk.f32.vlgmr.msra.gmra.mrb[0].mxu0 %vm709_vm1, %v4311_v43  ;;  %v1111_v43 = vld [vmem:[%s5168_s28 + $0x78] sm:$0xff] }
  0xa9   : > { %3667 = vmatpush3.bf16.msra.mxu0 %v3664_v5  ;;  %3219 = vmatprep.mubr.msk.f32.mxu0 %vm709_vm1, %v4307_v40  ;;  %v1109_v40 = vld [vmem:[%s5168_s28 + $0x68] sm:$0xff]  ;;  %v3708_v44 = vpack.c.bf16 %v1111_v43, %v1110_v42  ;;  %v2852_v42 = vld [vmem:[%s5168_s28 + $0xe0] sm:$0xff] }
  0xaa   : > { %3669 = vmatprep.subr.bf16.mxu0 %v3668_v10  ;;  %v2853_v43 = vld [vmem:[%s5168_s28 + $0xe8] sm:$0xff] }
  0xac   : > { %3220 = vmatmul.mubr.msk.f32.gmra.mrb[2].mxu0 %vm709_vm1, %v4305_v39  ;;  %v1108_v39 = vld [vmem:[%s5168_s28 + $0x60] sm:$0xff] }
  0xad   : > { %3671 = vmatpush3.bf16.msra.mxu0 %v3668_v10  ;;  %3238 = vmatprep.mubr.msk.f32.mxu0 %vm709_vm1, %v961_v16  ;;  %v3704_v41 = vpack.c.bf16 %v1109_v40, %v1108_v39  ;;  %v2842_v16 = vld [vmem:[%s5168_s28 + $0x90] sm:$0xff]  ;;  %v2851_v40 = vld [vmem:[%s5168_s28 + $0xd8] sm:$0xff] }
  0xae   : > { %3673 = vmatprep.subr.bf16.mxu0 %v3672_v15  ;;  %v2850_v39 = vld [vmem:[%s5168_s28 + $0xd0] sm:$0xff] }
  0xaf   : > { %3705 = vmatprep.subr.bf16.mxu1 %v3704_v41 }
  0xb0   : > { %3707 = vmatpush3.bf16.msra.mxu1 %v3704_v41  ;;  %v3732_v41 = vpack.c.bf16 %v2851_v40, %v2850_v39 }
  0xb1   : > { %3675 = vmatpush3.bf16.msra.mxu0 %v3672_v15  ;;  %3709 = vmatprep.subr.bf16.mxu1 %v3708_v44 }
  0xb2   : > { %3677 = vmatprep.subr.bf16.mxu0 %v3676_v19 }
  0xb4   : > { %3711 = vmatpush3.bf16.msra.mxu1 %v3708_v44  ;;  %v3736_v44 = vpack.c.bf16 %v2853_v43, %v2852_v42 }
  0xb5   : > { %3679 = vmatpush3.bf16.msra.mxu0 %v3676_v19  ;;  %3713 = vmatprep.subr.bf16.mxu1 %v3712_v49 }
  0xb8   : > { %3239 = vmatmul.mubr.msk.f32.vlgmr.msra.gmra.mrb[0].mxu0 %vm709_vm1, %v962_v26 }
  0xb9   : > { %3241 = vmatprep.mubr.msk.f32.mxu0 %vm709_vm1, %v963_v29  ;;  %v3716_v29 = vpack.c.bf16 %v2843_v17, %v2842_v16  ;;  %v2839_v16 = vld [vmem:[%s5171_s0] ss:$0 sm:$0xff]  ;;  %s4096_s0 = smov 112  }
  0xbc   : > { %3242 = vmatmul.mubr.msk.f32.gmra.mrb[2].mxu0 %vm709_vm1, %v964_v30 }
 0x18b   : > { %v3240_v51 = vpop.f32.mrb[0].mxu0 }
 0x18c   : > { %v4015_v52 = vadd.f32 %v3240_v51, %v2810_v50  ;;  %v1052_v53 = vpop.f32.mrb[1].mxu0  ;;  %v2857_v51 = vld [vmem:[%s5168_s28 + $0x108] sm:$0xff] }
 0x18d   : > { %v4016_v54 = vadd.f32 %v2810_v50, %v1052_v53  ;;  %v2858_v53 = vld [vmem:[%s5168_s28 + $0x110] sm:$0xff] }
 0x18e   : > { %v1076_v55 = vmul.f32 0.01, %v4015_v52 }
 0x18f   : > { %v1075_v57 = vmul.f32 0.01, %v4016_v54  ;;  %v3243_v58 = vpop.f32.mrb[2].mxu0 }
 0x190   : > { %v4452_v60 = vmax.f32 %v4015_v52, %v1076_v55  ;;  %v4017_v61 = vadd.f32 %v3243_v58, %v2810_v50  ;;  %v1062_v62 = vpop.f32.mrb[3].mxu0  ;;  %v2861_v58 = vld [vmem:[%s5168_s28 + $0x128] sm:$0xff] }
 0x191   : > { %v1079_v63 = vmax.f32 %v4016_v54, %v1075_v57  ;;  %v4018_v0 = vadd.f32 %v2810_v50, %v1062_v62  ;;  %v2856_v50 = vld [vmem:[%s5168_s28 + $0x100] sm:$0xff]  ;;  %v2859_v54 = vld [vmem:[%s5168_s28 + $0x118] sm:$0xff] }
 0x192   : > { %v1085_v1 = vrot.slane %v4452_v60, 7  ;;  %v1314_v2 = vrot.slane %v4452_v60, 1  ;;  %v1078_v3 = vmul.f32 0.01, %v4017_v61  ;;  %v3744_v52 = vpack.c.bf16 %v2857_v51, %v2856_v50  ;;  %v2860_v57 = vld [vmem:[%s5168_s28 + $0x120] sm:$0xff]  ;;  %v2888_v51 = vld [vmem:[%s5141_s8 + $0x28] sm:$0xff] }
 0x193   : > { %v1313_v4 = vrot.slane %v1079_v63, 1  ;;  %v1077_v5 = vmul.f32 0.01, %v4018_v0  ;;  %v1084_v6 = vrot.slane %v1079_v63, 7  ;;  %v3748_v55 = vpack.c.bf16 %v2859_v54, %v2858_v53  ;;  %v2887_v50 = vld [vmem:[%s5141_s8 + $0x20] sm:$0xff]  ;;  %v2935_v53 = vld [vmem:[%s5149_s16 + $0x10] sm:$0xff] }
 0x194   : > { %v4456_v7 = vmax.f32 %v4017_v61, %v1078_v3  ;;  %v3752_v61 = vpack.c.bf16 %v2861_v58, %v2860_v57  ;;  %v2866_v3 = vld [vmem:[%s5168_s28 + $0x150] sm:$0xff]  ;;  %v1547_v54 = vld [vmem:[%s5140_s7] sm:$0xff] }
 0x195   : > { %v4458_v8 = vmax.f32 %v4018_v0, %v1077_v5  ;;  %v1090_v9 = vsel %vm668_vm0, %v1084_v6, %v1085_v1  ;;  %v4464_v10 = vsel %vm931_vm2, %v1313_v4, %v1314_v2  ;;  %v2863_v0 = vld [vmem:[%s5168_s28 + $0x138] sm:$0xff]  ;;  %v1549_v57 = vld [vmem:[%s5140_s7 + $0x10] sm:$0xff] }
 0x196   : > { %v1316_v11 = vrot.slane %v4456_v7, 1  ;;  %v1087_v12 = vrot.slane %v4456_v7, 7  ;;  %v1093_v26 = vmul.f32 %v1090_v9, %v4337_v56  ;;  %v1321_v62 = vmul.f32 %v4464_v10, %v4381_v13  ;;  %v2865_v13 = vld [vmem:[%s5168_s28 + $0x148] sm:$0xff]  ;;  %v2870_v9 = vld [vmem:[%s5168_s28 + $0x170] sm:$0xff]  ;;  %v2871_v10 = vld [vmem:[%s5168_s28 + $0x178] sm:$0xff] }
 0x197   : > { %v1086_v14 = vrot.slane %v4458_v8, 7  ;;  %v1315_v15 = vrot.slane %v4458_v8, 1 }
 0x198   : > { %v1091_v18 = vsel %vm668_vm0, %v1087_v12, %v1084_v6  ;;  %v4480_v19 = vsel %vm931_vm2, %v1316_v11, %v1313_v4  ;;  %v2867_v4 = vld [vmem:[%s5168_s28 + $0x158] sm:$0xff]  ;;  %v2868_v6 = vld [vmem:[%s5168_s28 + $0x160] sm:$0xff] }
 0x199   : > { %v4484_v20 = vsel %vm931_vm2, %v1314_v2, %v1315_v15  ;;  %v1092_v21 = vmul.f32 %v1091_v18, %v4320_v48  ;;  %v1089_v23 = vsel %vm668_vm0, %v1085_v1, %v1086_v14  ;;  %v1088_v25 = vsel %vm668_vm0, %v1086_v14, %v1087_v12  ;;  %v2844_v48 = vld [vmem:[%s5168_s28 + $0xa0] sm:$0xff] }
 0x19a   : > { %v1094_v28 = vmul.f32 %v1089_v23, %v4318_v47  ;;  %v4495_v30 = vsel %vm931_vm2, %v1315_v15, %v1316_v11  ;;  %v1095_v47 = vmul.f32 %v1088_v25, %v4340_v59  ;;  %v3720_v56 = vpack.c.bf16 %v2845_v31, %v2844_v48  ;;  %v2849_v59 = vld [vmem:[%s5168_s28 + $0xc8] sm:$0xff]  ;;  %v2864_v1 = vld [vmem:[%s5168_s28 + $0x140] sm:$0xff] }
 0x19b   : > { %3276 = vmatprep.mubr.f32.mxu1 %v1092_v21  ;;  %v3728_v38 = vpack.c.bf16 %v2849_v59, %v2848_v35  ;;  %v3760_v2 = vpack.c.bf16 %v2865_v13, %v2864_v1  ;;  %v3764_v5 = vpack.c.bf16 %v2867_v4, %v2866_v3  ;;  %v3772_v11 = vpack.c.bf16 %v2871_v10, %v2870_v9  ;;  %v1553_v1 = vld [vmem:[%s5140_s7 + $0x30] sm:$0xff]  ;;  %v1554_v13 = vld [vmem:[%s5140_s7 + $0x38] sm:$0xff]  ;;  %v1555_v3 = vld [vmem:[%s5140_s7 + $0x40] sm:$0xff] }
 0x19c   : > { %3277 = vmatmul.mubr.f32.vlgmr.msra.gmra.mrb[0].mxu1 %v1093_v26  ;;  %v1322_v12 = vmul.f32 %v4484_v20, %v4401_v22  ;;  %v1323_v14 = vmul.f32 %v4495_v30, %v4405_v24  ;;  %v1324_v15 = vmul.f32 %v4480_v19, %v4410_v27  ;;  %v1556_v4 = vld [vmem:[%s5140_s7 + $0x48] sm:$0xff]  ;;  %v1559_v9 = vld [vmem:[%s5140_s7 + $0x60] sm:$0xff] }
 0x19d   : > { %3715 = vmatpush3.bf16.msra.mxu1 %v3712_v49  ;;  %3279 = vmatprep.mubr.f32.mxu1 %v1094_v28  ;;  %v3740_v49 = vpack.c.bf16 %v2855_v46, %v2854_v45  ;;  %v1463_v45 = vld [vmem:[%s5139_s6] sm:$0xff]  ;;  %v1560_v10 = vld [vmem:[%s5140_s7 + $0x68] sm:$0xff] }
 0x19e   : > { %3717 = vmatprep.subr.bf16.mxu1 %v3716_v29  ;;  %v1643_v46 = vld [vmem:[%s5141_s8] sm:$0xff] }
 0x1a0   : > { %3280 = vmatmul.mubr.f32.gmra.mrb[2].mxu1 %v1095_v47 }
 0x1a1   : > { %3719 = vmatpush3.bf16.msra.mxu1 %v3716_v29  ;;  %3314 = vmatprep.mubr.f32.mxu1 %v1079_v63  ;;  %v2862_v63 = vld [vmem:[%s5168_s28 + $0x130] sm:$0xff] }
 0x1a2   : > { %3721 = vmatprep.subr.bf16.mxu1 %v3720_v56 }
 0x1a5   : > { %3723 = vmatpush3.bf16.msra.mxu1 %v3720_v56 }
 0x1a6   : > { %3725 = vmatprep.subr.bf16.mxu1 %v3724_v34 }
 0x1a9   : > { %3727 = vmatpush3.bf16.msra.mxu1 %v3724_v34 }
 0x1aa   : > { %3729 = vmatprep.subr.bf16.mxu1 %v3728_v38 }
 0x1ad   : > { %3731 = vmatpush3.bf16.msra.mxu1 %v3728_v38 }
 0x1ae   : > { %3733 = vmatprep.subr.bf16.mxu1 %v3732_v41 }
 0x1b1   : > { %3735 = vmatpush3.bf16.msra.mxu1 %v3732_v41 }
 0x1b2   : > { %3737 = vmatprep.subr.bf16.mxu1 %v3736_v44 }
 0x1b5   : > { %3739 = vmatpush3.bf16.msra.mxu1 %v3736_v44 }
 0x1b6   : > { %3741 = vmatprep.subr.bf16.mxu1 %v3740_v49 }
 0x1b9   : > { %3743 = vmatpush3.bf16.msra.mxu1 %v3740_v49  ;;  %v1644_v49 = vld [vmem:[%s5141_s8 + $0x8] sm:$0xff] }
 0x1ba   : > { %3745 = vmatprep.subr.bf16.mxu1 %v3744_v52 }
 0x1bc   : > { %3315 = vmatmul.mubr.f32.vlgmr.msra.gmra.mrb[0].mxu1 %v4452_v60  ;;  %v3756_v60 = vpack.c.bf16 %v2863_v0, %v2862_v63  ;;  %v1551_v63 = vld [vmem:[%s5140_s7 + $0x20] sm:$0xff]  ;;  %v1552_v0 = vld [vmem:[%s5140_s7 + $0x28] sm:$0xff] }
 0x1bd   : > { %3317 = vmatprep.mubr.f32.mxu1 %v4458_v8  ;;  %3747 = vmatpush3.bf16.msra.mxu1 %v3744_v52  ;;  %v2528_v52 = vld [vmem:[%s5149_s16] sm:$0xff] }
 0x1be   : > { %3749 = vmatprep.subr.bf16.mxu1 %v3748_v55 }
 0x1c0   : > { %3318 = vmatmul.mubr.f32.gmra.mrb[2].mxu1 %v4456_v7  ;;  %v2869_v7 = vld [vmem:[%s5168_s28 + $0x168] sm:$0xff] }
 0x1c1   : > { %3751 = vmatpush3.bf16.msra.mxu1 %v3748_v55  ;;  %3352 = vmatprep.mubr.f32.mxu1 %v1321_v62  ;;  %v3768_v8 = vpack.c.bf16 %v2869_v7, %v2868_v6  ;;  %v1548_v55 = vld [vmem:[%s5140_s7 + $0x8] sm:$0xff]  ;;  %v1557_v6 = vld [vmem:[%s5140_s7 + $0x50] sm:$0xff]  ;;  %v1558_v7 = vld [vmem:[%s5140_s7 + $0x58] sm:$0xff] }
 0x1c2   : > { %3753 = vmatprep.subr.bf16.mxu1 %v3752_v61  ;;  %v3784_v58 = vpack.c.bf16 %v1548_v55, %v1547_v54  ;;  %v1974_v55 = vld [vmem:[%s5144_s11 + $0x30] sm:$0xff] }
 0x1c4   : > { %3785 = vmatprep.subr.bf16.mxu0 %v3784_v58 }
 0x1c5   : > { %3755 = vmatpush3.bf16.msra.mxu1 %v3752_v61  ;;  %v1550_v61 = vld [vmem:[%s5140_s7 + $0x18] sm:$0xff]  ;;  %3787 = vmatpush3.bf16.msra.mxu0 %v3784_v58 }
 0x1c6   : > { %3757 = vmatprep.subr.bf16.mxu1 %v3756_v60  ;;  %v3788_v62 = vpack.c.bf16 %v1550_v61, %v1549_v57  ;;  %v1975_v57 = vld [vmem:[%s5144_s11 + $0x38] sm:$0xff]  ;;  %v1976_v61 = vld [vmem:[%s5144_s11 + $0x40] sm:$0xff] }
 0x1c7   : > { %v3876_v58 = vpack.c.bf16 %v1975_v57, %v1974_v55 }
 0x1c8   : > { %3789 = vmatprep.subr.bf16.mxu0 %v3788_v62 }
 0x1c9   : > { %3759 = vmatpush3.bf16.msra.mxu1 %v3756_v60  ;;  %v3792_v60 = vpack.c.bf16 %v1552_v0, %v1551_v63  ;;  %3791 = vmatpush3.bf16.msra.mxu0 %v3788_v62  ;;  %v1977_v62 = vld [vmem:[%s5144_s11 + $0x48] sm:$0xff] }
 0x1ca   : > { %3761 = vmatprep.subr.bf16.mxu1 %v3760_v2  ;;  %v3880_v63 = vpack.c.bf16 %v1977_v62, %v1976_v61 }
 0x1cb   : > { %3793 = vmatprep.subr.bf16.mxu0 %v3792_v60 }
 0x1cd   : > { %3763 = vmatpush3.bf16.msra.mxu1 %v3760_v2  ;;  %v3796_v2 = vpack.c.bf16 %v1554_v13, %v1553_v1  ;;  %3795 = vmatpush3.bf16.msra.mxu0 %v3792_v60 }
 0x1ce   : > { %3765 = vmatprep.subr.bf16.mxu1 %v3764_v5 }
 0x1cf   : > { %3797 = vmatprep.subr.bf16.mxu0 %v3796_v2 }
 0x1d1   : > { %3767 = vmatpush3.bf16.msra.mxu1 %v3764_v5  ;;  %v3800_v5 = vpack.c.bf16 %v1556_v4, %v1555_v3  ;;  %3799 = vmatpush3.bf16.msra.mxu0 %v3796_v2  ;;  %v2879_v4 = vld [vmem:[%s5142_s9 + $0x50] sm:$0xff] }
 0x1d2   : > { %3769 = vmatprep.subr.bf16.mxu1 %v3768_v8 }
 0x1d3   : > { %3801 = vmatprep.subr.bf16.mxu0 %v3800_v5 }
 0x1d5   : > { %3771 = vmatpush3.bf16.msra.mxu1 %v3768_v8  ;;  %v3804_v8 = vpack.c.bf16 %v1558_v7, %v1557_v6  ;;  %3803 = vmatpush3.bf16.msra.mxu0 %v3800_v5  ;;  %v2880_v5 = vld [vmem:[%s5142_s9 + $0x58] sm:$0xff] }
 0x1d6   : > { %3773 = vmatprep.subr.bf16.mxu1 %v3772_v11 }
 0x1d7   : > { %3805 = vmatprep.subr.bf16.mxu0 %v3804_v8 }
 0x1d9   : > { %3775 = vmatpush3.bf16.msra.mxu1 %v3772_v11  ;;  %v3808_v11 = vpack.c.bf16 %v1560_v10, %v1559_v9  ;;  %3807 = vmatpush3.bf16.msra.mxu0 %v3804_v8 }
 0x1db   : > { %3809 = vmatprep.subr.bf16.mxu0 %v3808_v11 }
 0x1dc   : > { %3353 = vmatmul.mubr.f32.vlgmr.msra.gmra.mrb[0].mxu1 %v1322_v12  ;;  %v1561_v12 = vld [vmem:[%s5140_s7 + $0x70] sm:$0xff] }
 0x1dd   : > { %3355 = vmatprep.mubr.f32.mxu1 %v1323_v14  ;;  %v1562_v14 = vld [vmem:[%s5140_s7 + $0x78] sm:$0xff]  ;;  %3811 = vmatpush3.bf16.msra.mxu0 %v3808_v11 }
 0x1e0   : > { %3356 = vmatmul.mubr.f32.gmra.mrb[2].mxu1 %v1324_v15  ;;  %v3812_v15 = vpack.c.bf16 %v1562_v14, %v1561_v12 }
 0x1e1   : > { %3366 = vmatprep.mubr.msk.f32.mxu1 %vm1465_vm3, %v1463_v45  ;;  %v1969_v45 = vld [vmem:[%s5144_s11 + $0x8] sm:$0xff] }
 0x1e2   : > { %3813 = vmatprep.subr.bf16.mxu0 %v3812_v15 }
 0x1e3   : > { %3815 = vmatpush3.bf16.msra.mxu0 %v3812_v15  ;;  %v3836_v15 = vpack.c.bf16 %v2880_v5, %v2879_v4 }
 0x2af   : > { %v3354_v17 = vpop.f32.mrb[0].mxu1 }
 0x2b0   : > { %v4019_v18 = vadd.f32 %v3354_v17, %v2839_v16  ;;  %v1408_v21 = vpop.f32.mrb[1].mxu1 }
 0x2b1   : > { %v4020_v23 = vadd.f32 %v2839_v16, %v1408_v21 }
 0x2b2   : > { %v1432_v25 = vmul.f32 0.01, %v4019_v18 }
 0x2b3   : > { %v1431_v26 = vmul.f32 0.01, %v4020_v23  ;;  %v3357_v22 = vpop.f32.mrb[2].mxu1 }
 0x2b4   : > { %v1436_v20 = vmax.f32 %v4019_v18, %v1432_v25  ;;  %v4021_v28 = vadd.f32 %v3357_v22, %v2839_v16  ;;  %v1418_v24 = vpop.f32.mrb[3].mxu1 }
 0x2b5   : > { %v1435_v29 = vmax.f32 %v4020_v23, %v1431_v26  ;;  %v4022_v30 = vadd.f32 %v2839_v16, %v1418_v24 }
 0x2b6   : > { %v1440_v48 = vrot.slane %v1436_v20, 1  ;;  %v1434_v31 = vmul.f32 0.01, %v4021_v28 }
 0x2b7   : > { %v1439_v27 = vrot.slane %v1435_v29, 1  ;;  %v1433_v19 = vmul.f32 0.01, %v4022_v30 }
 0x2b8   : > { %v1438_v47 = vmax.f32 %v4021_v28, %v1434_v31  ;;  %v1658_v31 = vld [vmem:[%s5142_s9 + $0x8] sm:$0xff] }
 0x2b9   : > { %v1445_v56 = vsel %vm931_vm2, %v1439_v27, %v1440_v48  ;;  %v1437_v32 = vmax.f32 %v4022_v30, %v1433_v19  ;;  %v1464_v30 = vld [vmem:[%s5139_s6 + $0x8] sm:$0xff]  ;;  %v1659_v19 = vld [vmem:[%s5142_s9 + $0x10] sm:$0xff] }
 0x2ba   : > { %v4598_v33 = vmax.f32 %v1435_v29, %v1445_v56  ;;  %v1442_v34 = vrot.slane %v1438_v47, 1 }
 0x2bb   : > { %v1441_v35 = vrot.slane %v1437_v32, 1 }
 0x2bc   : > { %v1446_v59 = vsel %vm931_vm2, %v1442_v34, %v1439_v27 }
 0x2bd   : > { %v4602_v38 = vmax.f32 %v1438_v47, %v1446_v59  ;;  %v1443_v39 = vsel %vm931_vm2, %v1441_v35, %v1442_v34  ;;  %v1444_v40 = vsel %vm931_vm2, %v1440_v48, %v1441_v35  ;;  %v1657_v48 = vld [vmem:[%s5142_s9] sm:$0xff]  ;;  %v1660_v47 = vld [vmem:[%s5142_s9 + $0x18] sm:$0xff]  ;;  %v1662_v35 = vld [vmem:[%s5142_s9 + $0x28] sm:$0xff] }
 0x2be   : > { %v4608_v41 = vmax.f32 %v1437_v32, %v1443_v39  ;;  %v4610_v42 = vmax.f32 %v1436_v20, %v1444_v40  ;;  %v3816_v27 = vpack.c.bf16 %v1658_v31, %v1657_v48  ;;  %v1661_v34 = vld [vmem:[%s5142_s9 + $0x20] sm:$0xff]  ;;  %v1664_v39 = vld [vmem:[%s5142_s9 + $0x38] sm:$0xff] }
 0x2bf   : > { %v3824_v59 = vpack.c.bf16 %v1662_v35, %v1661_v34  ;;  %v2893_v31 = vld [vmem:[%s5142_s9 + $0xa0] sm:$0xff]  ;;  %v1978_v35 = vld [vmem:[%s5144_s11 + $0x50] sm:$0xff] }
 0x2c0   : > { %v4068_v43 = vpack.i.bf16 %v4610_v42, %v4598_v33  ;;  %v4073_v44 = vpack.i.bf16 %v4602_v38, %v4608_v41  ;;  %3817 = vmatprep.subr.bf16.mxu0 %v3816_v27 }
 0x2c2   : > { %4069 = vrot.lane.b32.xlu0 %v4068_v43, %s4092_s5  ;;  %4074 = vrot.lane.b32.xlu1 %v4073_v44, %s4092_s5  ;;  %v1968_v44 = vld [vmem:[%s5144_s11] sm:$0xff] }
 0x2c6   : > { %1647 = vperm.xlu0 %4066, %v1643_v46   ;;  %1652 = vperm.xlu1 %4067, %v1644_v49   ;;  %v1970_v46 = vld [vmem:[%s5144_s11 + $0x10] sm:$0xff]  ;;  %v3864_v49 = vpack.c.bf16 %v1969_v45, %v1968_v44  ;;  %v2900_v45 = vld [vmem:[%s5144_s11 + $0x80] sm:$0xff] }
 0x2ca   : > { %1855 = vperm.xlu0 %4066, %v2887_v50   ;;  %1860 = vperm.xlu1 %4067, %v2888_v51   ;;  %v1971_v50 = vld [vmem:[%s5144_s11 + $0x18] sm:$0xff] }
 0x2cb   : > { %v3868_v51 = vpack.c.bf16 %v1971_v50, %v1970_v46  ;;  %v2901_v46 = vld [vmem:[%s5144_s11 + $0x88] sm:$0xff]  ;;  %v2876_v50 = vld [vmem:[%s5143_s10] ss:$0 sm:$0xff] }
 0x2ce   : > { %2531 = vperm.xlu1 %4067, %v2528_v52   ;;  %v1972_v52 = vld [vmem:[%s5144_s11 + $0x20] sm:$0xff] }
 0x2d2   : > { %2556 = vperm.xlu1 %4067, %v2935_v53   ;;  %v1973_v53 = vld [vmem:[%s5144_s11 + $0x28] sm:$0xff] }
 0x2d3   : > { %v3872_v54 = vpack.c.bf16 %v1973_v53, %v1972_v52 }
 0x334   : > { %v4070_v16 = vpop.permute.xlu0 %4069  ;;  %v4075_v17 = vpop.permute.xlu1 %4074 }
 0x335   : > { %v4072_v18 = vunpack.i.h.bf16 %v4070_v16  ;;  %v4071_v21 = vunpack.i.l.bf16 %v4070_v16  ;;  %v4077_v23 = vunpack.i.h.bf16 %v4075_v17  ;;  %v4076_v25 = vunpack.i.l.bf16 %v4075_v17  ;;  %v2881_v16 = vld [vmem:[%s5142_s9 + $0x60] sm:$0xff]  ;;  %v2882_v17 = vld [vmem:[%s5142_s9 + $0x68] sm:$0xff] }
 0x337   : > { %v1460_v26 = vmax.f32 %v4610_v42, %v4072_v18  ;;  %v1459_v22 = vmax.f32 %v4598_v33, %v4071_v21  ;;  %v1462_v20 = vmax.f32 %v4602_v38, %v4077_v23  ;;  %v1461_v28 = vmax.f32 %v4608_v41, %v4076_v25  ;;  %v1663_v38 = vld [vmem:[%s5142_s9 + $0x30] sm:$0xff]  ;;  %v2877_v41 = vld [vmem:[%s5142_s9 + $0x40] sm:$0xff]  ;;  %v2878_v42 = vld [vmem:[%s5142_s9 + $0x48] sm:$0xff] }
 0x338   : > { %v3820_v33 = vpack.c.bf16 %v1660_v47, %v1659_v19  ;;  %v3828_v40 = vpack.c.bf16 %v1664_v39, %v1663_v38  ;;  %v3832_v43 = vpack.c.bf16 %v2878_v42, %v2877_v41  ;;  %v3840_v18 = vpack.c.bf16 %v2882_v17, %v2881_v16  ;;  %v2883_v21 = vld [vmem:[%s5142_s9 + $0x70] sm:$0xff]  ;;  %v2884_v23 = vld [vmem:[%s5142_s9 + $0x78] sm:$0xff]  ;;  %v1980_v39 = vld [vmem:[%s5144_s11 + $0x60] sm:$0xff] }
 0x339   : > { %v3776_v24 = vpack.c.bf16 %v1460_v26, %v1459_v22  ;;  %v3780_v29 = vpack.c.bf16 %v1462_v20, %v1461_v28  ;;  %v3844_v25 = vpack.c.bf16 %v2884_v23, %v2883_v21  ;;  %v2889_v26 = vld [vmem:[%s5142_s9 + $0x80] sm:$0xff]  ;;  %v2890_v22 = vld [vmem:[%s5142_s9 + $0x88] sm:$0xff]  ;;  %v2891_v28 = vld [vmem:[%s5142_s9 + $0x90] sm:$0xff] }
 0x33a   : > { %v3848_v20 = vpack.c.bf16 %v2890_v22, %v2889_v26  ;;  %v2895_v47 = vld [vmem:[%s5142_s9 + $0xb0] sm:$0xff]  ;;  %v2908_v16 = vld [vmem:[%s5144_s11 + $0xc0] sm:$0xff]  ;;  %v2909_v17 = vld [vmem:[%s5144_s11 + $0xc8] sm:$0xff] }
 0x33b   : > { %3777 = vmatprep.subr.bf16.mxu1 %v3776_v24  ;;  %v1982_v42 = vld [vmem:[%s5144_s11 + $0x70] sm:$0xff]  ;;  %v2911_v23 = vld [vmem:[%s5144_s11 + $0xd8] sm:$0xff]  ;;  %v2912_v26 = vld [vmem:[%s5144_s11 + $0xe0] sm:$0xff] }
 0x33c   : > { %3779 = vmatpush3.bf16.msra.mxu1 %v3776_v24  ;;  %v2892_v24 = vld [vmem:[%s5142_s9 + $0x98] sm:$0xff]  ;;  %v2910_v21 = vld [vmem:[%s5144_s11 + $0xd0] sm:$0xff]  ;;  %v2913_v22 = vld [vmem:[%s5144_s11 + $0xe8] sm:$0xff] }
 0x33d   : > { %3781 = vmatprep.subr.bf16.mxu1 %v3780_v29 }
 0x340   : > { %3783 = vmatpush3.bf16.msra.mxu1 %v3780_v29 }
 0x341   : > { %3865 = vmatprep.subr.bf16.mxu1 %v3864_v49 }
 0x343   : > { %3367 = vmatmul.mubr.msk.f32.vlgmr.msra.gmra.mrb[4].mxu1 %vm1465_vm3, %v1464_v30  ;;  %v3852_v30 = vpack.c.bf16 %v2892_v24, %v2891_v28  ;;  %v2914_v28 = vld [vmem:[%s5144_s11 + $0xf0] sm:$0xff]  ;;  %v2915_v24 = vld [vmem:[%s5144_s11 + $0xf8] sm:$0xff] }
 0x344   : > { %3867 = vmatpush3.bf16.msra.mxu1 %v3864_v49  ;;  %v3896_v49 = vpack.c.bf16 %v2901_v46, %v2900_v45  ;;  %v2928_v46 = vld [vmem:[%s5144_s11 + $0x160] sm:$0xff] }
 0x345   : > { %3869 = vmatprep.subr.bf16.mxu1 %v3868_v51  ;;  %v4760_v6 = vpop.permute.xlu0 %1647  ;;  %v4762_v7 = vpop.permute.xlu1 %1652 }
 0x348   : > { %3871 = vmatpush3.bf16.msra.mxu1 %v3868_v51 }
 0x349   : > { %3873 = vmatprep.subr.bf16.mxu1 %v3872_v54  ;;  %v4801_v29 = vpop.permute.xlu0 %1855 }
 0x34c   : > { %3875 = vmatpush3.bf16.msra.mxu1 %v3872_v54 }
 0x34d   : > { %3877 = vmatprep.subr.bf16.mxu1 %v3876_v58 }
 0x350   : > { %3879 = vmatpush3.bf16.msra.mxu1 %v3876_v58 }
 0x351   : > { %3881 = vmatprep.subr.bf16.mxu1 %v3880_v63 }
 0x354   : > { %3883 = vmatpush3.bf16.msra.mxu1 %v3880_v63 }
 0x416   : > { %v3368_v56 = vpop.f32.mrb[4].mxu1 }
 0x417   : > { %v1538_v32 = vpop.f32.mrb[5].mxu1 }
 0x418   : > { %3401 = vmatprep.mubr.f32.mxu0 %v1538_v32 }
 0x419   : > { %3402 = vmatmul.mubr.f32.vlgmr.msra.gmra.mrb[4].mxu0 %v3368_v56  ;;  %v2896_v56 = vld [vmem:[%s5142_s9 + $0xb8] sm:$0xff] }
 0x41a   : > { %3819 = vmatpush3.bf16.msra.mxu0 %v3816_v27  ;;  %v2894_v27 = vld [vmem:[%s5142_s9 + $0xa8] sm:$0xff]  ;;  %v3860_v32 = vpack.c.bf16 %v2896_v56, %v2895_v47  ;;  %v2919_v47 = vld [vmem:[%s5144_s11 + $0x118] sm:$0xff] }
 0x41b   : > { %3821 = vmatprep.subr.bf16.mxu0 %v3820_v33  ;;  %v3856_v19 = vpack.c.bf16 %v2894_v27, %v2893_v31  ;;  %v2917_v31 = vld [vmem:[%s5144_s11 + $0x108] sm:$0xff] }
 0x41e   : > { %3823 = vmatpush3.bf16.msra.mxu0 %v3820_v33  ;;  %v4818_v33 = vpop.permute.xlu1 %1860 }
 0x41f   : > { %3825 = vmatprep.subr.bf16.mxu0 %v3824_v59 }
 0x422   : > { %3827 = vmatpush3.bf16.msra.mxu0 %v3824_v59  ;;  %v1979_v59 = vld [vmem:[%s5144_s11 + $0x58] sm:$0xff] }
 0x423   : > { %3829 = vmatprep.subr.bf16.mxu0 %v3828_v40  ;;  %v3884_v38 = vpack.c.bf16 %v1979_v59, %v1978_v35  ;;  %v2921_v35 = vld [vmem:[%s5144_s11 + $0x128] sm:$0xff] }
 0x425   : > { %3885 = vmatprep.subr.bf16.mxu1 %v3884_v38 }
 0x426   : > { %3831 = vmatpush3.bf16.msra.mxu0 %v3828_v40  ;;  %3887 = vmatpush3.bf16.msra.mxu1 %v3884_v38  ;;  %v1981_v40 = vld [vmem:[%s5144_s11 + $0x68] sm:$0xff]  ;;  %v2922_v38 = vld [vmem:[%s5144_s11 + $0x130] sm:$0xff] }
 0x427   : > { %3833 = vmatprep.subr.bf16.mxu0 %v3832_v43  ;;  %v3888_v41 = vpack.c.bf16 %v1981_v40, %v1980_v39  ;;  %v2924_v40 = vld [vmem:[%s5144_s11 + $0x140] sm:$0xff] }
 0x429   : > { %3889 = vmatprep.subr.bf16.mxu1 %v3888_v41 }
 0x42a   : > { %3891 = vmatpush3.bf16.msra.mxu1 %v3888_v41  ;;  %v2925_v41 = vld [vmem:[%s5144_s11 + $0x148] sm:$0xff] }
 0x4ec   : > { %v3403_v0 = vpop.f32.mrb[4].mxu0 }
 0x4ed   : > { %v1640_v60 = vrot.slane %v3403_v0, 7  ;;  %v1847_v1 = vrot.slane %v3403_v0, 1  ;;  %v1629_v13 = vpop.f32.mrb[5].mxu0 }
 0x4ee   : > { %v1639_v2 = vrot.slane %v1629_v13, 7  ;;  %v1846_v3 = vrot.slane %v1629_v13, 1 }
 0x4f0   : > { %v1641_v8 = vsel %vm668_vm0, %v1639_v2, %v1640_v60  ;;  %v1642_v9 = vsel %vm668_vm0, %v1640_v60, %v1639_v2  ;;  %v1848_v10 = vsel %vm931_vm2, %v1846_v3, %v1847_v1  ;;  %v1849_v11 = vsel %vm931_vm2, %v1847_v1, %v1846_v3  ;;  %v2902_v1 = vld [vmem:[%s5144_s11 + $0x90] sm:$0xff] }
 0x4f1   : > { %v1656_v12 = vmul.f32 %v4762_v7, %v1641_v8  ;;  %v1655_v14 = vmul.f32 %v4760_v6, %v1642_v9  ;;  %v1863_v48 = vmul.f32 %v4801_v29, %v1848_v10  ;;  %v1864_v34 = vmul.f32 %v4818_v33, %v1849_v11  ;;  %v2904_v11 = vld [vmem:[%s5144_s11 + $0xa0] sm:$0xff] }
 0x4f3   : > { %3420 = vmatprep.mubr.msk.f32.mxu0 %vm709_vm1, %v1655_v14 }
 0x4f4   : > { %3421 = vmatmul.mubr.msk.f32.vlgmr.msra.gmra.mrb[6].mxu0 %vm709_vm1, %v1656_v12  ;;  %v2905_v12 = vld [vmem:[%s5144_s11 + $0xa8] sm:$0xff] }
 0x4f5   : > { %3835 = vmatpush3.bf16.msra.mxu0 %v3832_v43  ;;  %3439 = vmatprep.mubr.msk.f32.mxu0 %vm709_vm1, %v1629_v13  ;;  %v1983_v43 = vld [vmem:[%s5144_s11 + $0x78] sm:$0xff]  ;;  %v3904_v14 = vpack.c.bf16 %v2905_v12, %v2904_v11  ;;  %v2934_v11 = vld [vmem:[%s5149_s16 + $0x8] sm:$0xff] }
 0x4f6   : > { %3837 = vmatprep.subr.bf16.mxu0 %v3836_v15  ;;  %v3892_v44 = vpack.c.bf16 %v1983_v43, %v1982_v42  ;;  %v2903_v13 = vld [vmem:[%s5144_s11 + $0x98] sm:$0xff]  ;;  %v3944_v42 = vpack.c.bf16 %v2925_v41, %v2924_v40  ;;  %v2926_v43 = vld [vmem:[%s5144_s11 + $0x150] sm:$0xff]  ;;  %v2439_v41 = vld [vmem:[%s5148_s15 + $0x8] sm:$0xff] }
 0x4f7   : > { %v3900_v10 = vpack.c.bf16 %v2903_v13, %v2902_v1  ;;  %v2936_v12 = vld [vmem:[%s5149_s16 + $0x18] sm:$0xff] }
 0x4f8   : > { %3893 = vmatprep.subr.bf16.mxu1 %v3892_v44 }
 0x4f9   : > { %3839 = vmatpush3.bf16.msra.mxu0 %v3836_v15  ;;  %3895 = vmatpush3.bf16.msra.mxu1 %v3892_v44  ;;  %v2927_v44 = vld [vmem:[%s5144_s11 + $0x158] sm:$0xff] }
 0x4fa   : > { %3841 = vmatprep.subr.bf16.mxu0 %v3840_v18  ;;  %3897 = vmatprep.subr.bf16.mxu1 %v3896_v49  ;;  %v3948_v45 = vpack.c.bf16 %v2927_v44, %v2926_v43  ;;  %v2438_v44 = vld [vmem:[%s5148_s15] sm:$0xff] }
 0x4fd   : > { %3843 = vmatpush3.bf16.msra.mxu0 %v3840_v18  ;;  %v3912_v18 = vpack.c.bf16 %v2909_v17, %v2908_v16  ;;  %v2352_v16 = vld [vmem:[%s5147_s14] sm:$0xff]  ;;  %v2353_v17 = vld [vmem:[%s5147_s14 + $0x8] sm:$0xff] }
 0x4fe   : > { %3845 = vmatprep.subr.bf16.mxu0 %v3844_v25 }
 0x501   : > { %3847 = vmatpush3.bf16.msra.mxu0 %v3844_v25  ;;  %v3916_v25 = vpack.c.bf16 %v2911_v23, %v2910_v21  ;;  %v2277_v21 = vld [vmem:[%s5146_s13] sm:$0xff]  ;;  %v3964_v23 = vpack.c.bf16 %v2353_v17, %v2352_v16 }
 0x502   : > { %3849 = vmatprep.subr.bf16.mxu0 %v3848_v20 }
 0x504   : > { %3440 = vmatmul.mubr.msk.f32.vlgmr.msra.gmra.mrb[6].mxu0 %vm709_vm1, %v3403_v0 }
 0x505   : > { %3851 = vmatpush3.bf16.msra.mxu0 %v3848_v20  ;;  %3458 = vmatprep.mubr.msk.f32.mxu0 %vm709_vm1, %v1863_v48  ;;  %v3920_v20 = vpack.c.bf16 %v2913_v22, %v2912_v26  ;;  %v2916_v48 = vld [vmem:[%s5144_s11 + $0x100] sm:$0xff]  ;;  %v2355_v26 = vld [vmem:[%s5147_s14 + $0x18] sm:$0xff] }
 0x506   : > { %3853 = vmatprep.subr.bf16.mxu0 %v3852_v30  ;;  %v3928_v27 = vpack.c.bf16 %v2917_v31, %v2916_v48  ;;  %v2359_v48 = vld [vmem:[%s5147_s14 + $0x38] sm:$0xff] }
 0x509   : > { %3855 = vmatpush3.bf16.msra.mxu0 %v3852_v30  ;;  %v3924_v30 = vpack.c.bf16 %v2915_v24, %v2914_v28  ;;  %v2357_v28 = vld [vmem:[%s5147_s14 + $0x28] sm:$0xff] }
 0x50a   : > { %3857 = vmatprep.subr.bf16.mxu0 %v3856_v19 }
 0x50d   : > { %3859 = vmatpush3.bf16.msra.mxu0 %v3856_v19  ;;  %v2918_v19 = vld [vmem:[%s5144_s11 + $0x110] sm:$0xff] }
 0x50e   : > { %3861 = vmatprep.subr.bf16.mxu0 %v3860_v32  ;;  %v3932_v56 = vpack.c.bf16 %v2919_v47, %v2918_v19  ;;  %v2361_v19 = vld [vmem:[%s5147_s14 + $0x48] sm:$0xff] }
 0x511   : > { %3863 = vmatpush3.bf16.msra.mxu0 %v3860_v32 }
 0x514   : > { %3459 = vmatmul.mubr.msk.f32.vlgmr.msra.gmra.mrb[6].mxu0 %vm709_vm1, %v1864_v34  ;;  %v2920_v34 = vld [vmem:[%s5144_s11 + $0x120] sm:$0xff] }
 0x515   : > { %v3936_v59 = vpack.c.bf16 %v2921_v35, %v2920_v34  ;;  %v2364_v35 = vld [vmem:[%s5147_s14 + $0x60] sm:$0xff] }
 0x5e7   : > { %v3460_v51 = vpop.f32.mrb[6].mxu0 }
 0x5e8   : > { %v4023_v52 = vadd.f32 %v3460_v51, %v2876_v50  ;;  %v1946_v53 = vpop.f32.mrb[7].mxu0  ;;  %v2930_v51 = vld [vmem:[%s5144_s11 + $0x170] sm:$0xff] }
 0x5e9   : > { %v4024_v54 = vadd.f32 %v2876_v50, %v1946_v53 }
 0x5ea   : > { %v1958_v55 = vmul.f32 0.01, %v4023_v52 }
 0x5eb   : > { %v1957_v57 = vmul.f32 0.01, %v4024_v54 }
 0x5ec   : > { %v1960_v58 = vmax.f32 %v4023_v52, %v1958_v55  ;;  %v2931_v52 = vld [vmem:[%s5144_s11 + $0x178] sm:$0xff]  ;;  %v2899_v55 = vld [vmem:[%s5145_s12] ss:$0 sm:$0xff] }
 0x5ed   : > { %v1959_v61 = vmax.f32 %v4024_v54, %v1957_v57  ;;  %v3956_v53 = vpack.c.bf16 %v2931_v52, %v2930_v51  ;;  %v2442_v52 = vld [vmem:[%s5148_s15 + $0x20] sm:$0xff] }
 0x5ee   : > { %v1963_v62 = vrot.slane %v1960_v58, 7  ;;  %v2162_v63 = vrot.slane %v1960_v58, 1 }
 0x5ef   : > { %v1962_v0 = vrot.slane %v1959_v61, 7  ;;  %v2161_v60 = vrot.slane %v1959_v61, 1 }
 0x5f1   : > { %v1965_v2 = vsel %vm668_vm0, %v1963_v62, %v1962_v0  ;;  %v1964_v3 = vsel %vm668_vm0, %v1962_v0, %v1963_v62  ;;  %v2163_v4 = vsel %vm931_vm2, %v2161_v60, %v2162_v63  ;;  %v4863_v5 = vsel %vm931_vm2, %v2162_v63, %v2161_v60 }
 0x5f2   : > { %v1966_v8 = vmul.f32 %v1965_v2, %v4760_v6  ;;  %v1967_v9 = vmul.f32 %v1964_v3, %v4762_v7  ;;  %v2906_v6 = vld [vmem:[%s5144_s11 + $0xb0] sm:$0xff]  ;;  %v2907_v7 = vld [vmem:[%s5144_s11 + $0xb8] sm:$0xff]  ;;  %v2165_v32 = vmul.f32 %v2163_v4, %v4801_v29  ;;  %v2166_v54 = vmul.f32 %v4863_v5, %v4818_v33 }
 0x5f3   : > { %v3908_v15 = vpack.c.bf16 %v2907_v7, %v2906_v6  ;;  %v2923_v29 = vld [vmem:[%s5144_s11 + $0x138] sm:$0xff]  ;;  %v4093_v2 = vmov 0.0|0.0   ;;  %v4095_v33 = vmov 0.0  }
 0x5f4   : > { %3493 = vmatprep.mubr.f32.mxu1 %v1966_v8  ;;  %v3940_v39 = vpack.c.bf16 %v2923_v29, %v2922_v38  ;;  %3960 = vmatprep.subr.bf16.mxu0 %v4093_v2  ;;  %v2366_v29 = vld [vmem:[%s5147_s14 + $0x70] sm:$0xff] }
 0x5f5   : > { %3494 = vmatmul.mubr.f32.vlgmr.msra.gmra.mrb[6].mxu1 %v1967_v9  ;;  %3570 = vmatprep.mubr.msk.f32.mxu0 %vm4094_vm4, %v4095_v33 }
 0x5f6   : > { %3899 = vmatpush3.bf16.msra.mxu1 %v3896_v49  ;;  %3528 = vmatprep.mubr.f32.mxu1 %v1959_v61  ;;  %v2929_v49 = vld [vmem:[%s5144_s11 + $0x168] sm:$0xff] }
 0x5f7   : > { %3901 = vmatprep.subr.bf16.mxu1 %v3900_v10  ;;  %v3952_v50 = vpack.c.bf16 %v2929_v49, %v2928_v46  ;;  %v2443_v46 = vld [vmem:[%s5148_s15 + $0x28] sm:$0xff]  ;;  %v2445_v49 = vld [vmem:[%s5148_s15 + $0x38] sm:$0xff] }
 0x5f8   : > { %v3991_v51 = vpack.c.bf16 %v2445_v49, %v2443_v46 }
 0x5fa   : > { %3903 = vmatpush3.bf16.msra.mxu1 %v3900_v10 }
 0x5fb   : > { %3905 = vmatprep.subr.bf16.mxu1 %v3904_v14 }
 0x5fe   : > { %3907 = vmatpush3.bf16.msra.mxu1 %v3904_v14 }
 0x5ff   : > { %3909 = vmatprep.subr.bf16.mxu1 %v3908_v15 }
 0x602   : > { %3911 = vmatpush3.bf16.msra.mxu1 %v3908_v15 }
 0x603   : > { %3913 = vmatprep.subr.bf16.mxu1 %v3912_v18 }
 0x606   : > { %3915 = vmatpush3.bf16.msra.mxu1 %v3912_v18 }
 0x607   : > { %3917 = vmatprep.subr.bf16.mxu1 %v3916_v25 }
 0x60a   : > { %3919 = vmatpush3.bf16.msra.mxu1 %v3916_v25  ;;  %v2354_v25 = vld [vmem:[%s5147_s14 + $0x10] sm:$0xff] }
 0x60b   : > { %3921 = vmatprep.subr.bf16.mxu1 %v3920_v20  ;;  %v3967_v22 = vpack.c.bf16 %v2355_v26, %v2354_v25 }
 0x60e   : > { %3923 = vmatpush3.bf16.msra.mxu1 %v3920_v20  ;;  %v2356_v20 = vld [vmem:[%s5147_s14 + $0x20] sm:$0xff] }
 0x60f   : > { %3925 = vmatprep.subr.bf16.mxu1 %v3924_v30  ;;  %v3970_v24 = vpack.c.bf16 %v2357_v28, %v2356_v20  ;;  %v2655_v20 = vld [vmem:[%s5152_s19] sm:$0xff]  ;;  %v2656_v28 = vld [vmem:[%s5152_s19 + $0x8] sm:$0xff] }
 0x612   : > { %3927 = vmatpush3.bf16.msra.mxu1 %v3924_v30  ;;  %v2358_v30 = vld [vmem:[%s5147_s14 + $0x30] sm:$0xff] }
 0x613   : > { %3929 = vmatprep.subr.bf16.mxu1 %v3928_v27  ;;  %v3973_v31 = vpack.c.bf16 %v2359_v48, %v2358_v30  ;;  %v2571_v48 = vld [vmem:[%s5150_s17] sm:$0x3] }
 0x615   : > { %3529 = vmatmul.mubr.f32.vlgmr.msra.gmra.mrb[6].mxu1 %v1960_v58 }
 0x616   : > { %3931 = vmatpush3.bf16.msra.mxu1 %v3928_v27  ;;  %3563 = vmatprep.mubr.f32.mxu1 %v2165_v32  ;;  %v2360_v27 = vld [vmem:[%s5147_s14 + $0x40] sm:$0xff]  ;;  %v2363_v32 = vld [vmem:[%s5147_s14 + $0x58] sm:$0xff] }
 0x617   : > { %3933 = vmatprep.subr.bf16.mxu1 %v3932_v56  ;;  %v3976_v47 = vpack.c.bf16 %v2361_v19, %v2360_v27  ;;  %v2657_v27 = vld [vmem:[%s5152_s19 + $0x10] sm:$0xff]  ;;  %v2658_v19 = vld [vmem:[%s5152_s19 + $0x18] sm:$0xff] }
 0x61a   : > { %3935 = vmatpush3.bf16.msra.mxu1 %v3932_v56  ;;  %v2362_v56 = vld [vmem:[%s5147_s14 + $0x50] sm:$0xff] }
 0x61b   : > { %3937 = vmatprep.subr.bf16.mxu1 %v3936_v59  ;;  %v3979_v34 = vpack.c.bf16 %v2363_v32, %v2362_v56  ;;  %v2659_v56 = vld [vmem:[%s5152_s19 + $0x20] sm:$0xff]  ;;  %v2660_v32 = vld [vmem:[%s5152_s19 + $0x28] sm:$0xff] }
 0x61e   : > { %3939 = vmatpush3.bf16.msra.mxu1 %v3936_v59  ;;  %v2365_v59 = vld [vmem:[%s5147_s14 + $0x68] sm:$0xff] }
 0x61f   : > { %3941 = vmatprep.subr.bf16.mxu1 %v3940_v39  ;;  %v3982_v38 = vpack.c.bf16 %v2365_v59, %v2364_v35  ;;  %v2662_v35 = vld [vmem:[%s5152_s19 + $0x38] sm:$0xff] }
 0x622   : > { %3943 = vmatpush3.bf16.msra.mxu1 %v3940_v39  ;;  %v2367_v39 = vld [vmem:[%s5147_s14 + $0x78] sm:$0xff] }
 0x623   : > { %3945 = vmatprep.subr.bf16.mxu1 %v3944_v42  ;;  %v3985_v40 = vpack.c.bf16 %v2367_v39, %v2366_v29 }
 0x626   : > { %3947 = vmatpush3.bf16.msra.mxu1 %v3944_v42  ;;  %v2441_v42 = vld [vmem:[%s5148_s15 + $0x18] sm:$0xff] }
 0x627   : > { %3949 = vmatprep.subr.bf16.mxu1 %v3948_v45  ;;  %v3987_v43 = vpack.c.bf16 %v2441_v42, %v2439_v41 }
 0x62a   : > { %3951 = vmatpush3.bf16.msra.mxu1 %v3948_v45  ;;  %v2440_v45 = vld [vmem:[%s5148_s15 + $0x10] sm:$0xff] }
 0x62b   : > { %3953 = vmatprep.subr.bf16.mxu1 %v3952_v50 }
 0x62e   : > { %3955 = vmatpush3.bf16.msra.mxu1 %v3952_v50  ;;  %v3989_v50 = vpack.c.bf16 %v2440_v45, %v2438_v44 }
 0x62f   : > { %3957 = vmatprep.subr.bf16.mxu1 %v3956_v53 }
 0x632   : > { %3959 = vmatpush3.bf16.msra.mxu1 %v3956_v53  ;;  %v2444_v53 = vld [vmem:[%s5148_s15 + $0x30] sm:$0xff] }
 0x635   : > { %3564 = vmatmul.mubr.f32.vlgmr.msra.gmra.mrb[6].mxu1 %v2166_v54 }
 0x708   : > { %v3565_v57 = vpop.f32.mrb[6].mxu1 }
 0x709   : > { %v4025_v58 = vadd.f32 %v3565_v57, %v2899_v55  ;;  %v2250_v61 = vpop.f32.mrb[7].mxu1  ;;  %v2449_v57 = vld [vmem:[%s5148_s15 + $0x58] sm:$0xff] }
 0x70a   : > { %v4026_v62 = vadd.f32 %v2899_v55, %v2250_v61  ;;  %v2447_v55 = vld [vmem:[%s5148_s15 + $0x48] sm:$0xff]  ;;  %v3993_v61 = vpack.c.bf16 %v2444_v53, %v2442_v52 }
 0x70b   : > { %v2262_v63 = vmul.f32 0.01, %v4025_v58 }
 0x70c   : > { %v2261_v0 = vmul.f32 0.01, %v4026_v62 }
 0x70d   : > { %v2264_v60 = vmax.f32 %v4025_v58, %v2262_v63  ;;  %v2446_v63 = vld [vmem:[%s5148_s15 + $0x40] sm:$0xff] }
 0x70e   : > { %v2263_v1 = vmax.f32 %v4026_v62, %v2261_v0  ;;  %v3995_v62 = vpack.c.bf16 %v2449_v57, %v2447_v55  ;;  %v2448_v0 = vld [vmem:[%s5148_s15 + $0x50] sm:$0xff] }
 0x70f   : > { %v2266_v13 = vrot.slane %v2264_v60, 1 }
 0x710   : > { %v2265_v3 = vrot.slane %v2263_v1, 1 }
 0x712   : > { %v2267_v4 = vsel %vm931_vm2, %v2265_v3, %v2266_v13  ;;  %v2268_v5 = vsel %vm931_vm2, %v2266_v13, %v2265_v3  ;;  %v3997_v13 = vpack.c.bf16 %v2448_v0, %v2446_v63 }
 0x713   : > { %v2269_v8 = vmax.f32 %v2263_v1, %v2267_v4  ;;  %v2270_v9 = vmax.f32 %v2264_v60, %v2268_v5  ;;  %v2451_v60 = vld [vmem:[%s5148_s15 + $0x68] sm:$0xff]  ;;  %v2453_v1 = vld [vmem:[%s5148_s15 + $0x78] sm:$0xff]  ;;  %v2450_v4 = vld [vmem:[%s5148_s15 + $0x60] sm:$0xff] }
 0x714   : > { %v3999_v3 = vpack.c.bf16 %v2453_v1, %v2451_v60  ;;  %v2452_v5 = vld [vmem:[%s5148_s15 + $0x70] sm:$0xff] }
 0x715   : > { %v4078_v10 = vpack.i.bf16 %v2270_v9, %v2269_v8 }
 0x717   : > { %4079 = vrot.lane.b32.xlu0 %v4078_v10, %s4096_s0 }
 0x71b   : > { %2547 = vperm.xlu0 %4066, %v2934_v11  }
 0x71f   : > { %2566 = vperm.xlu0 %4066, %v2936_v12  }
 0x789   : > { %v4080_v14 = vpop.permute.xlu0 %4079 }
 0x78a   : > { %v4082_v6 = vunpack.i.h.bf16 %v4080_v14  ;;  %v4081_v7 = vunpack.i.l.bf16 %v4080_v14  ;;  %v2532_v14 = vpop.permute.xlu1 %2531 }
 0x78c   : > { %v2276_v37 = vmax.f32 %v2270_v9, %v4082_v6  ;;  %v2275_v15 = vmax.f32 %v2269_v8, %v4081_v7  ;;  %v4001_v8 = vpack.c.bf16 %v2452_v5, %v2450_v4  ;;  %v2542_v7 = vand.u32 127, %v666_v36 }
 0x78e   : > { %v3961_v18 = vpack.c.bf16 %v2276_v37, %v2275_v15  ;;  %v2557_v37 = vpop.permute.xlu1 %2556  ;;  %vm2543_vm6 = vcmp.lt.s32.totalorder %v2542_v7, 64 }
 0x790   : > { %3962 = vmatpush3.bf16.msra.mxu0 %v3961_v18 }
 0x791   : > { %3963 = vmatprep.subr.bf16.mxu0 %v4093_v2 }
 0x793   : > { %3571 = vmatmul.mubr.msk.f32.vlgmr.msra.gmra.mrb[8].mxu0 %vm2278_vm5, %v2277_v21 }
 0x794   : > { %3965 = vmatpush3.bf16.msra.mxu0 %v3964_v23  ;;  %3605 = vmatprep.mubr.msk.f32.mxu0 %vm4094_vm4, %v4095_v33 }
 0x795   : > { %3966 = vmatprep.subr.bf16.mxu0 %v4093_v2 }
 0x798   : > { %3968 = vmatpush3.bf16.msra.mxu0 %v3967_v22 }
 0x799   : > { %3969 = vmatprep.subr.bf16.mxu0 %v4093_v2 }
 0x79a   : > { %v2548_v6 = vpop.permute.xlu0 %2547 }
 0x79c   : > { %3971 = vmatpush3.bf16.msra.mxu0 %v3970_v24 }
 0x79d   : > { %3972 = vmatprep.subr.bf16.mxu0 %v4093_v2 }
 0x79e   : > { %v2567_v15 = vpop.permute.xlu0 %2566 }
 0x7a0   : > { %3974 = vmatpush3.bf16.msra.mxu0 %v3973_v31  ;;  %v4004_v31 = vpack.c.bf16 %v2656_v28, %v2655_v20 }
 0x7a1   : > { %3975 = vmatprep.subr.bf16.mxu0 %v4093_v2 }
 0x7a4   : > { %3977 = vmatpush3.bf16.msra.mxu0 %v3976_v47  ;;  %v4007_v47 = vpack.c.bf16 %v2658_v19, %v2657_v27 }
 0x7a5   : > { %3978 = vmatprep.subr.bf16.mxu0 %v4093_v2 }
 0x7a8   : > { %3980 = vmatpush3.bf16.msra.mxu0 %v3979_v34  ;;  %v4010_v34 = vpack.c.bf16 %v2660_v32, %v2659_v56 }
 0x7a9   : > { %3981 = vmatprep.subr.bf16.mxu0 %v4093_v2 }
 0x7ac   : > { %3983 = vmatpush3.bf16.msra.mxu0 %v3982_v38  ;;  %v2937_v38 = vld [vmem:[%s5151_s18] ss:$0 sm:$0xff] }
 0x7ad   : > { %3984 = vmatprep.subr.bf16.mxu0 %v4093_v2 }
 0x7b0   : > { %3986 = vmatpush3.bf16.msra.mxu0 %v3985_v40 }
 0x7b1   : > { %3988 = vmatprep.subr.bf16.mxu0 %v3987_v43 }
 0x866   : > { %v2348_v54 = vpop.f32.mrb[8].mxu0 }
 0x867   : > { %v3572_v58 = vpop.f32.mrb[9].mxu0  ;;  %3606 = vmatmul.mubr.f32.vlgmr.msra.gmra.mrb[10].mxu0 %v2348_v54 }
 0x868   : > { %3990 = vmatpush1.bf16.msra.mxu0 %v3989_v50  ;;  %2521 = vmatprep.mubr.f32.mxu0 %v4095_v33 }
 0x869   : > { %3992 = vmatprep.subr.bf16.mxu0 %v3991_v51 }
 0x86c   : > { %3994 = vmatpush1.bf16.msra.mxu0 %v3993_v61 }
 0x86d   : > { %3996 = vmatprep.subr.bf16.mxu0 %v3995_v62 }
 0x870   : > { %3998 = vmatpush1.bf16.msra.mxu0 %v3997_v13 }
 0x871   : > { %4000 = vmatprep.subr.bf16.mxu0 %v3999_v3 }
 0x874   : > { %4002 = vmatpush1.bf16.msra.mxu0 %v4001_v8 }
 0x875   : > { %3608 = vmatprep.subr.mxu0 %v4095_v33 }
 0x93a   : > { %v2434_v9 = vpop.f32.mrb[10].mxu0 }
 0x93b   : > { %v3607_v10 = vpop.f32.mrb[11].mxu0  ;;  %2933 = vmatmul.mubr.msk.f32.vlgmr.msra.gmra.mrb[12].mxu0 %vm709_vm1, %v2434_v9 }
 0x93c   : > { %3610 = vmatprep.mubr.msk.f32.mxu0 %vm4094_vm4, %v4095_v33 }
 0xa0e   : > { %v2523_v11 = vpop.f32.mrb[12].mxu0 }
 0xa0f   : > { %2537 = vrot.lane.b32.xlu1 %v2523_v11, %s4097_s23  ;;  %v2525_v12 = vpop.f32.mrb[13].mxu0  ;;  %v2534_v21 = vmul.f32 %v2532_v14, %v2523_v11 }
 0xa10   : > { %2539 = vrot.lane.b32.xlu0 %v2525_v12, %s4097_s23  ;;  %v2559_v26 = vmul.f32 %v2557_v37, %v2525_v12 }
 0xa81   : > { %v2538_v16 = vpop.permute.xlu1 %2537 }
 0xa82   : > { %v2540_v17 = vpop.permute.xlu0 %2539 }
 0xa83   : > { %v2544_v18 = vsel %vm2543_vm6, %v2538_v16, %v2540_v17  ;;  %v2563_v25 = vsel %vm2543_vm6, %v2540_v17, %v2538_v16 }
 0xa84   : > { %v2550_v23 = vmul.f32 %v2548_v6, %v2544_v18  ;;  %v2569_v24 = vmul.f32 %v2567_v15, %v2563_v25 }
 0xa86   : > { %v2551_v22 = vadd.f32 %v2550_v23, %v2534_v21 }
 0xa88   : > { %v2560_v36 = vadd.f32 %v2559_v26, %v2551_v22 }
 0xa8a   : > { %v2570_v30 = vadd.f32 %v2569_v24, %v2560_v36 }
 0xa8c   : > { %3609 = vmatpush3.msra.mxu0 %v2570_v30 }
 0xa8d   : > { %3611 = vmatmul.mubr.msk.f32.vlgmr.msra.gmra.mrb[14].mxu0 %vm2579_vm7, %v2571_v48  ;;  %4003 = vmatprep.subr.bf16.mxu0 %v4093_v2 }
 0xa8e   : > { %4005 = vmatpush3.bf16.msra.mxu0 %v4004_v31  ;;  %3629 = vmatprep.mubr.msk.f32.mxu0 %vm4094_vm4, %v4095_v33  ;;  %v2661_v33 = vld [vmem:[%s5152_s19 + $0x30] sm:$0xff] }
 0xa8f   : > { %4006 = vmatprep.subr.bf16.mxu0 %v4093_v2  ;;  %v4013_v59 = vpack.c.bf16 %v2662_v35, %v2661_v33 }
 0xa92   : > { %4008 = vmatpush3.bf16.msra.mxu0 %v4007_v47 }
 0xa93   : > { %4009 = vmatprep.subr.bf16.mxu0 %v4093_v2 }
 0xa96   : > { %4011 = vmatpush3.bf16.msra.mxu0 %v4010_v34 }
 0xa97   : > { %4012 = vmatprep.subr.bf16.mxu0 %v4093_v2  ;;  %v2939_v2 = vld [vmem:[%s5153_s20] ss:$0 sm:$0xff] }
 0xa9a   : > { %4014 = vmatpush3.bf16.msra.mxu0 %v4013_v59 }
 0xb60   : > { %v2649_v29 = vpop.f32.mrb[14].mxu0 }
 0xb61   : > { %v2650_v39 = vadd.f32 %v2937_v38, %v2649_v29  ;;  %v3612_v40 = vpop.f32.mrb[15].mxu0 }
 0xb63   : > { %v2653_v41 = vmul.f32 0.01, %v2650_v39 }
 0xb65   : > { %v2654_v42 = vmax.f32 %v2650_v39, %v2653_v41 }
 0xb67   : > { %3630 = vmatmul.mubr.msk.f32.vlgmr.msra.gmra.mrb[16].mxu0 %vm709_vm1, %v2654_v42 }
 0xc3a   : > { %v2739_v43 = vpop.f32.mrb[16].mxu0 }
 0xc3b   : > { %v2740_v44 = vadd.f32 %v2939_v2, %v2739_v43  ;;  %v3631_v45 = vpop.f32.mrb[17].mxu0 }
 0xc3d   : > { %2744 = vst.msk [vmem:[%s656_s27] sm:$0x3] %vm2743_vm8, %v2740_v44 }
 0xc3e PF: > { %s5172_s29 = sld [smem:[#allocation2_spill]] }
 0xc44   : > { %s31_s2 = sadd.s32 1, %s5172_s29  }
 0xc45   : > { %p28_p5 = scmp.ge.s32.totalorder %s31_s2, 4  }
 0xc47   :  { %30 = sbr.rel (!%p28_p5) target bundleno = 7 (0x7), region = 147 }

</bundles_post_ra>
